<compile_context>
chip_gen: v7x
topology: tpu7x:2x2x1
jax: 0.10.0
libtpu: 0.0.40
codegen_flags: <defaults>
</compile_context>

<pallas_src>
import math
from functools import partial

import jax
import jax.numpy as jnp
from jax import lax
from jax.experimental import pallas as pl
from jax.experimental.pallas import tpu as pltpu

# Module hyper-parameters (synthetic, small).
D = 32                      # embedding dim
NUM_HEADS = 4
HEAD_DIM = D // NUM_HEADS   # 8
MLP_RATIO = 4.0
HIDDEN = int(D * MLP_RATIO) # 128
LN_EPS = 1e-5               # torch nn.LayerNorm default eps
MXU_BF16 = True             # bf16 MXU operands, f32 accumulation (gated approximation)


# ----------------------------- in-kernel math ------------------------------

def _gelu_tanh(x):
    # tanh-approximate GELU: transcendental goes to the EUP slot instead of a
    # ~12-op f32 erf polynomial on the VALU.  ~1e-3 accurate vs exact erf GELU.
    c = math.sqrt(2.0 / math.pi)
    return 0.5 * x * (1.0 + jnp.tanh(c * (x + 0.044715 * x * x * x)))


def _cast(t):
    return t.astype(jnp.bfloat16) if MXU_BF16 else t


def _mm_t(a, b):
    # a: (P, K), b: (Q, K) -> (P, Q); contracts last dims (== a @ b.T), f32 acc.
    return lax.dot_general(a, b, (((1,), (1,)), ((), ())),
                           preferred_element_type=jnp.float32)


def _mm(a, b):
    # (P, K) @ (K, Q) with f32 accumulation.
    return jnp.dot(a, b, preferred_element_type=jnp.float32)


def _idiv(t, d):
    # integer divide by a constant; shift for powers of two (no vector div).
    if d & (d - 1) == 0:
        return t >> int(math.log2(d))
    return t // d


def _imod(t, d):
    if d & (d - 1) == 0:
        return t & (d - 1)
    return t % d


# ------------------------------- the kernel --------------------------------

def _lt_block_kernel(x_ref, l_ref,
                     wx_ref, bx_ref, wl_ref, bl_ref, wcq_ref, bcq_ref,
                     opw_ref, opb_ref, w1_ref, b1_ref, w2_ref, b2_ref,
                     ffng_ref, ffnb_ref, out_ref, *, B, N, M):
    x = x_ref[...]        # (B*N, D)  flattened patch tokens (x_res), batch-major
    L = l_ref[...]        # (B*M, D)  flattened label tokens (L_res)

    def norm(z):
        # LayerNorm WITHOUT affine -- the gamma/beta of norms 0..3 are folded
        # into the in-projection weights in the wrapper.
        mu = jnp.mean(z, axis=-1, keepdims=True)
        zc = z - mu
        var = jnp.mean(zc * zc, axis=-1, keepdims=True)
        return zc * lax.rsqrt(var + LN_EPS)

    scale = 1.0 / math.sqrt(HEAD_DIM)

    def attend(q, k, v, a, lq, lk):
        # q: (B*lq, D); k, v: (B*lk, D), batch elements stacked along rows.
        # All B*NUM_HEADS attention problems are solved with ONE score matmul
        # and ONE PV matmul: K/V head-lane blocks are placed block-diagonally
        # along a (NUM_HEADS*B*lk)-row operand, and a static batch-validity
        # mask on the scores keeps the softmax per (batch, head) block.
        blq, blk = B * lq, B * lk
        R = NUM_HEADS * blk

        # head block-diagonal mask: rows (h, b, k) x lanes (h', d); 1 iff h == h'
        hb_r = _idiv(lax.broadcasted_iota(jnp.int32, (R, D), 0), blk)
        hb_c = _idiv(lax.broadcasted_iota(jnp.int32, (R, D), 1), HEAD_DIM)
        bd = hb_r == hb_c

        k_stack = jnp.concatenate([k] * NUM_HEADS, axis=0)            # (R, D)
        v_stack = jnp.concatenate([v] * NUM_HEADS, axis=0)            # (R, D)
        k_bd = jnp.where(bd, k_stack, 0.0)
        # PV operand: [block-diag V | head indicator] -> numerator AND per-head
        # softmax denominator from a single matmul.
        pv_op = jnp.concatenate([jnp.where(bd, v_stack, 0.0),
                                 jnp.where(bd, 1.0, 0.0)], axis=1)    # (R, 2D)

        s = _mm_t(_cast(q), _cast(k_bd)) * scale                      # (blq, R)
        # static batch-validity mask: query batch must equal key batch
        q_b = _idiv(lax.broadcasted_iota(jnp.int32, (blq, R), 0), lq)
        k_b = _idiv(_imod(lax.broadcasted_iota(jnp.int32, (blq, R), 1), blk), lk)
        s = jnp.where(q_b == k_b, s, -1e30)

        # row-global max is a per-(row, head-block) constant -> valid shift
        p = jnp.exp(s - jnp.max(s, axis=-1, keepdims=True))
        od = _mm(_cast(p), _cast(pv_op))                              # (blq, 2D)
        o = od[:, :D] * pl.reciprocal(od[:, D:], approx=True)         # (blq, D)
        return _mm_t(_cast(o), opw_ref[a]) + opb_ref[a:a + 1, :]      # fused out-proj

    # 1) patch self-attention + cross-attn K/V: one fused projection off the
    #    shared x-hat (affines of norm_patch1 / norm_cross_x folded in wrapper)
    x_hat = norm(x)
    px = _mm_t(_cast(x_hat), wx_ref[...]) + bx_ref[...]               # (B*N, 5D)
    x_sa = x + attend(px[:, 0:D], px[:, D:2 * D], px[:, 2 * D:3 * D], 0, N, N)

    # 2) label-only self-attention (NO residual, per reference module)
    lqkv = _mm_t(_cast(norm(L)), wl_ref[...]) + bl_ref[...]           # (B*M, 3D)
    L_sa = attend(lqkv[:, 0:D], lqkv[:, D:2 * D], lqkv[:, 2 * D:3 * D], 1, M, M)

    # 3) cross-attention: label queries attend to patch K/V built from x_res;
    #    residual uses the ORIGINAL L (L_res)
    q_c = _mm_t(_cast(norm(L_sa)), wcq_ref[...]) + bcq_ref[...]       # (B*M, D)
    L_new = L + attend(q_c, px[:, 3 * D:4 * D], px[:, 4 * D:5 * D], 2, M, N)

    # 4) FFN on concatenated tokens; residual is normed + ffn(normed), exactly
    #    as in the module.  Single dense write to one output ref.
    cat = jnp.concatenate([x_sa, L_new], axis=0)                      # (B*(N+M), D)
    zn = norm(cat) * ffng_ref[...] + ffnb_ref[...]
    h = _gelu_tanh(_mm_t(_cast(zn), w1_ref[...]) + b1_ref[...])       # (T, HIDDEN)
    out_ref[...] = zn + _mm_t(_cast(h), w2_ref[...]) + b2_ref[...]


# --------------------------------- wrapper ---------------------------------

def _fold(w, b, g, beta):
    # Linear(w, b) applied to (z*g + beta)  ==  Linear(w*diag(g), b + w@beta) on z
    return w * g[None, :], b + w @ beta


@jax.jit
def lt_vit_block(x, L, params):
    B, N, _ = x.shape
    _, M, _ = L.shape
    ln_g, ln_b, ipw, ipb, opw, opb, w1, b1, w2, b2 = params

    # -- wrapper-side algebra: fold LN affines (norms 0..3) into in-proj weights
    wp,  bp  = _fold(ipw[0],     ipb[0].reshape(-1),     ln_g[0], ln_b[0])  # patch QKV
    wlab, blab = _fold(ipw[1],   ipb[1].reshape(-1),     ln_g[1], ln_b[1])  # label QKV
    wcq, bcq = _fold(ipw[2, :D], ipb[2, 0],              ln_g[3], ln_b[3])  # cross Q
    wck, bck = _fold(ipw[2, D:], ipb[2, 1:].reshape(-1), ln_g[2], ln_b[2])  # cross KV
    w_x = jnp.concatenate([wp, wck], axis=0)       # (5D, D): patch q|k|v | cross k|v
    b_x = jnp.concatenate([bp, bck])[None, :]      # (1, 5D)
    b_l = blab[None, :]
    b_cq = bcq[None, :]

    wt = jnp.bfloat16 if MXU_BF16 else jnp.float32     # MXU-operand dtype for weights
    w_x, wlab, wcq = w_x.astype(wt), wlab.astype(wt), wcq.astype(wt)
    opw_c, w1_c, w2_c = opw.astype(wt), w1.astype(wt), w2.astype(wt)

    xf = x.reshape(B * N, D)        # token-flattened layouts (layout plumbing in
    lf = L.reshape(B * M, D)        # the wrapper, not inside the kernel)
    T = B * (N + M)

    args = (xf, lf, w_x, b_x, wlab, b_l, wcq, b_cq,
            opw_c, opb, w1_c, b1, w2_c, b2, ln_g[4:5], ln_b[4:5])

    def full(arr):  # whole array resident, same block every (single) grid step
        return pl.BlockSpec(arr.shape, lambda i, _nd=arr.ndim: (0,) * _nd)

    kernel = partial(_lt_block_kernel, B=B, N=N, M=M)

    grid_spec = pltpu.PrefetchScalarGridSpec(
        num_scalar_prefetch=0,
        grid=(1,),                  # single step: whole batch + weights fit in VMEM
        in_specs=[full(a) for a in args],
        out_specs=pl.BlockSpec((T, D), lambda i: (0, 0)),
    )
    out = pl.pallas_call(
        kernel,
        out_shape=jax.ShapeDtypeStruct((T, D), jnp.float32),
        grid_spec=grid_spec,
        compiler_params=pltpu.CompilerParams(
            dimension_semantics=("arbitrary",)),
    )(*args)

    # TODO(synk): amortize launch overhead — fuse several LT-ViT blocks (layers)
    # per pallas_call and/or a larger B; on v7x a 2-way "parallel" batch grid
    # would use both TensorCores (skipped at B=2 where step overhead dominates).
    # TODO(synk): pack 4 tokens per 128-lane row for the element-wise tail and
    # the output store once the per-call token count grows (D=32 -> masked vst).
    x_out = out[:B * N].reshape(B, N, D)
    L_out = out[B * N:].reshape(B, M, D)
    return x_out, L_out


# --------------------------- parameters & reference ------------------------

def init_params(key):
    ks = jax.random.split(key, 10)
    nrm = lambda k, shp, s=0.05: (s * jax.random.normal(k, shp)).astype(jnp.float32)
    ln_g = (1.0 + nrm(ks[0], (5, D), 0.02)).astype(jnp.float32)   # 5 LayerNorms
    ln_b = nrm(ks[1], (5, D), 0.02)
    ipw = nrm(ks[2], (3, 3 * D, D))      # stacked in_proj weights (3 MHAs)
    ipb = nrm(ks[3], (3, 3, D), 0.02)    # pre-split q/k/v biases, leading axis
    opw = nrm(ks[4], (3, D, D))          # stacked out_proj weights
    opb = nrm(ks[5], (3, D), 0.02)
    w1 = nrm(ks[6], (HIDDEN, D))         # ffn.0 Linear(D, HIDDEN)
    b1 = nrm(ks[7], (1, HIDDEN), 0.02)
    w2 = nrm(ks[8], (D, HIDDEN))         # ffn.3 Linear(HIDDEN, D)
    b2 = nrm(ks[9], (1, D), 0.02)
    return (ln_g, ln_b, ipw, ipb, opw, opb, w1, b1, w2, b2)


def reference(x, L, params):
    """Pure-JAX reference mirroring the PyTorch forward (eval mode)."""
    ln_g, ln_b, ipw, ipb, opw, opb, w1, b1, w2, b2 = params
    hp = jax.lax.Precision.HIGHEST

    def lnorm(z, i):
        mu = jnp.mean(z, -1, keepdims=True)
        var = jnp.mean((z - mu) ** 2, -1, keepdims=True)
        return (z - mu) / jnp.sqrt(var + LN_EPS) * ln_g[i] + ln_b[i]

    def mha(q_in, kv_in, a):
        wq, wk, wv = ipw[a, :D], ipw[a, D:2 * D], ipw[a, 2 * D:]
        bq, bk, bv = ipb[a, 0], ipb[a, 1], ipb[a, 2]
        q = jnp.einsum('bld,ed->ble', q_in, wq, precision=hp) + bq
        k = jnp.einsum('bld,ed->ble', kv_in, wk, precision=hp) + bk
        v = jnp.einsum('bld,ed->ble', kv_in, wv, precision=hp) + bv
        B_, Lq, _ = q.shape
        Lk = k.shape[1]
        qh = q.reshape(B_, Lq, NUM_HEADS, HEAD_DIM)
        kh = k.reshape(B_, Lk, NUM_HEADS, HEAD_DIM)
        vh = v.reshape(B_, Lk, NUM_HEADS, HEAD_DIM)
        s = jnp.einsum('bqhd,bkhd->bhqk', qh, kh, precision=hp) / math.sqrt(HEAD_DIM)
        p = jax.nn.softmax(s, axis=-1)
        o = jnp.einsum('bhqk,bkhd->bqhd', p, vh, precision=hp).reshape(B_, Lq, D)
        return jnp.einsum('bld,ed->ble', o, opw[a], precision=hp) + opb[a]

    x_res = x
    x_sa = x + mha(lnorm(x, 0), lnorm(x, 0), 0)
    L_sa = mha(lnorm(L, 1), lnorm(L, 1), 1)
    L_new = L + mha(lnorm(L_sa, 3), lnorm(x_res, 2), 2)
    cat = jnp.concatenate([x_sa, L_new], axis=1)
    zn = lnorm(cat, 4)
    h = jax.nn.gelu(jnp.einsum('bld,hd->blh', zn, w1, precision=hp) + b1[0],
                    approximate=False)
    ff = zn + jnp.einsum('blh,dh->bld', h, w2, precision=hp) + b2[0]
    N = x.shape[1]
    return ff[:, :N], ff[:, N:]


# ----------------------------------- main -----------------------------------

if __name__ == "__main__":
    B, N, M = 2, 16, 8
    key = jax.random.PRNGKey(0)
    kx, kl, kp = jax.random.split(key, 3)
    x = jax.random.normal(kx, (B, N, D), jnp.float32)
    L = jax.random.normal(kl, (B, M, D), jnp.float32)
    params = init_params(kp)

    x_out, L_out = lt_vit_block(x, L, params)
    jax.block_until_ready((x_out, L_out))

    xr, lr = reference(x, L, params)
    assert x_out.shape == (B, N, D) and L_out.shape == (B, M, D)
    err = max(float(jnp.max(jnp.abs(x_out - xr))),
              float(jnp.max(jnp.abs(L_out - lr))))
    # tanh-GELU, approx-reciprocal softmax and bf16 MXU operands (f32 accumulation)
    # are deliberate, documented approximations vs the exact f32 reference.
    assert err < 2e-2, f"max abs error vs reference: {err}"
    print("KERNEL_OK")
</pallas_src>

<mosaic_0001>
module attributes {stable_mosaic.version = 11 : i64} {
  func.func @_lt_block_kernel(%arg0: i32, %arg1: memref<32x32xf32, #tpu.memory_space<vmem>>, %arg2: memref<16x32xf32, #tpu.memory_space<vmem>>, %arg3: memref<160x32xbf16, #tpu.memory_space<vmem>>, %arg4: memref<1x160xf32, #tpu.memory_space<vmem>>, %arg5: memref<96x32xbf16, #tpu.memory_space<vmem>>, %arg6: memref<1x96xf32, #tpu.memory_space<vmem>>, %arg7: memref<32x32xbf16, #tpu.memory_space<vmem>>, %arg8: memref<1x32xf32, #tpu.memory_space<vmem>>, %arg9: memref<3x32x32xbf16, #tpu.memory_space<vmem>>, %arg10: memref<3x32xf32, #tpu.memory_space<vmem>>, %arg11: memref<128x32xbf16, #tpu.memory_space<vmem>>, %arg12: memref<1x128xf32, #tpu.memory_space<vmem>>, %arg13: memref<32x128xbf16, #tpu.memory_space<vmem>>, %arg14: memref<1x32xf32, #tpu.memory_space<vmem>>, %arg15: memref<1x32xf32, #tpu.memory_space<vmem>>, %arg16: memref<1x32xf32, #tpu.memory_space<vmem>>, %arg17: memref<48x32xf32, #tpu.memory_space<vmem>>) attributes {dimension_semantics = [#tpu.dimension_semantics<arbitrary>], iteration_bounds = array<i64: 1>, scalar_prefetch = 0 : i64, scratch_operands = 0 : i64, tpu.core_type = #tpu.core_type<tc>, window_params = [{pipeline_mode = #tpu.pipeline_mode<synchronous>, transform_indices = @transform_0, window_bounds = array<i64: 32, 32>}, {pipeline_mode = #tpu.pipeline_mode<synchronous>, transform_indices = @transform_1, window_bounds = array<i64: 16, 32>}, {pipeline_mode = #tpu.pipeline_mode<synchronous>, transform_indices = @transform_2, window_bounds = array<i64: 160, 32>}, {pipeline_mode = #tpu.pipeline_mode<synchronous>, transform_indices = @transform_3, window_bounds = array<i64: 1, 160>}, {pipeline_mode = #tpu.pipeline_mode<synchronous>, transform_indices = @transform_4, window_bounds = array<i64: 96, 32>}, {pipeline_mode = #tpu.pipeline_mode<synchronous>, transform_indices = @transform_5, window_bounds = array<i64: 1, 96>}, {pipeline_mode = #tpu.pipeline_mode<synchronous>, transform_indices = @transform_6, window_bounds = array<i64: 32, 32>}, {pipeline_mode = #tpu.pipeline_mode<synchronous>, transform_indices = @transform_7, window_bounds = array<i64: 1, 32>}, {pipeline_mode = #tpu.pipeline_mode<synchronous>, transform_indices = @transform_8, window_bounds = array<i64: 3, 32, 32>}, {pipeline_mode = #tpu.pipeline_mode<synchronous>, transform_indices = @transform_9, window_bounds = array<i64: 3, 32>}, {pipeline_mode = #tpu.pipeline_mode<synchronous>, transform_indices = @transform_10, window_bounds = array<i64: 128, 32>}, {pipeline_mode = #tpu.pipeline_mode<synchronous>, transform_indices = @transform_11, window_bounds = array<i64: 1, 128>}, {pipeline_mode = #tpu.pipeline_mode<synchronous>, transform_indices = @transform_12, window_bounds = array<i64: 32, 128>}, {pipeline_mode = #tpu.pipeline_mode<synchronous>, transform_indices = @transform_13, window_bounds = array<i64: 1, 32>}, {pipeline_mode = #tpu.pipeline_mode<synchronous>, transform_indices = @transform_14, window_bounds = array<i64: 1, 32>}, {pipeline_mode = #tpu.pipeline_mode<synchronous>, transform_indices = @transform_15, window_bounds = array<i64: 1, 32>}, {pipeline_mode = #tpu.pipeline_mode<synchronous>, transform_indices = @transform_16, window_bounds = array<i64: 48, 32>}]} {
    %c0 = arith.constant 0 : index
    %c0_0 = arith.constant 0 : index
    %0 = vector.load %arg1[%c0, %c0_0] : memref<32x32xf32, #tpu.memory_space<vmem>>, vector<32x32xf32>
    %c0_1 = arith.constant 0 : index
    %c0_2 = arith.constant 0 : index
    %1 = vector.load %arg2[%c0_1, %c0_2] : memref<16x32xf32, #tpu.memory_space<vmem>>, vector<16x32xf32>
    %cst = arith.constant dense<0.000000e+00> : vector<32xf32>
    %2 = vector.multi_reduction <add>, %0, %cst [1] : vector<32x32xf32> to vector<32xf32>
    %3 = vector.shape_cast %2 : vector<32xf32> to vector<32x1xf32>
    %cst_3 = arith.constant 3.200000e+01 : f32
    %4 = vector.broadcast %cst_3 : f32 to vector<32x1xf32>
    %5 = arith.divf %3, %4 : vector<32x1xf32>
    %6 = vector.broadcast %5 : vector<32x1xf32> to vector<32x32xf32>
    %7 = arith.subf %0, %6 : vector<32x32xf32>
    %8 = arith.mulf %7, %7 : vector<32x32xf32>
    %cst_4 = arith.constant dense<0.000000e+00> : vector<32xf32>
    %9 = vector.multi_reduction <add>, %8, %cst_4 [1] : vector<32x32xf32> to vector<32xf32>
    %10 = vector.shape_cast %9 : vector<32xf32> to vector<32x1xf32>
    %cst_5 = arith.constant 3.200000e+01 : f32
    %11 = vector.broadcast %cst_5 : f32 to vector<32x1xf32>
    %12 = arith.divf %10, %11 : vector<32x1xf32>
    %cst_6 = arith.constant 9.99999974E-6 : f32
    %13 = vector.broadcast %cst_6 : f32 to vector<32x1xf32>
    %14 = arith.addf %12, %13 : vector<32x1xf32>
    %15 = math.rsqrt %14 : vector<32x1xf32>
    %16 = vector.broadcast %15 : vector<32x1xf32> to vector<32x32xf32>
    %17 = arith.mulf %7, %16 : vector<32x32xf32>
    %18 = arith.truncf %17 : vector<32x32xf32> to vector<32x32xbf16>
    %c0_7 = arith.constant 0 : index
    %c0_8 = arith.constant 0 : index
    %19 = vector.load %arg3[%c0_7, %c0_8] : memref<160x32xbf16, #tpu.memory_space<vmem>>, vector<160x32xbf16>
    %cst_9 = arith.constant dense<0.000000e+00> : vector<32x160xf32>
    %20 = tpu.matmul %18, %19, %cst_9 {dimension_numbers = #tpu.dot_dimension_numbers<[1], [1], [0], [0], [0, 0, 1, 0], [], []>} : vector<32x32xbf16>, vector<160x32xbf16>, vector<32x160xf32> -> vector<32x160xf32>
    %c0_10 = arith.constant 0 : index
    %c0_11 = arith.constant 0 : index
    %21 = vector.load %arg4[%c0_10, %c0_11] : memref<1x160xf32, #tpu.memory_space<vmem>>, vector<1x160xf32>
    %22 = vector.broadcast %21 : vector<1x160xf32> to vector<32x160xf32>
    %23 = arith.addf %20, %22 : vector<32x160xf32>
    %24 = vector.extract_strided_slice %23 {offsets = [0, 0], sizes = [32, 32], strides = [1, 1]} : vector<32x160xf32> to vector<32x32xf32>
    %25 = vector.extract_strided_slice %23 {offsets = [0, 32], sizes = [32, 32], strides = [1, 1]} : vector<32x160xf32> to vector<32x32xf32>
    %26 = vector.extract_strided_slice %23 {offsets = [0, 64], sizes = [32, 32], strides = [1, 1]} : vector<32x160xf32> to vector<32x32xf32>
    %27 = tpu.iota {dimensions = array<i32: 0>} : vector<128x32xi32>
    %c5_i32 = arith.constant 5 : i32
    %28 = vector.broadcast %c5_i32 : i32 to vector<128x32xi32>
    %29 = arith.shrsi %27, %28 : vector<128x32xi32>
    %30 = tpu.iota {dimensions = array<i32: 1>} : vector<128x32xi32>
    %c3_i32 = arith.constant 3 : i32
    %31 = vector.broadcast %c3_i32 : i32 to vector<128x32xi32>
    %32 = arith.shrsi %30, %31 : vector<128x32xi32>
    %33 = arith.cmpi eq, %29, %32 : vector<128x32xi32>
    %34 = tpu.concatenate %25, %25, %25, %25 in 0 : vector<32x32xf32>, vector<32x32xf32>, vector<32x32xf32>, vector<32x32xf32> -> vector<128x32xf32>
    %35 = tpu.concatenate %26, %26, %26, %26 in 0 : vector<32x32xf32>, vector<32x32xf32>, vector<32x32xf32>, vector<32x32xf32> -> vector<128x32xf32>
    %cst_12 = arith.constant 0.000000e+00 : f32
    %36 = vector.broadcast %cst_12 : f32 to vector<128x32xf32>
    %37 = arith.select %33, %34, %36 : vector<128x32xi1>, vector<128x32xf32>
    %cst_13 = arith.constant 0.000000e+00 : f32
    %38 = vector.broadcast %cst_13 : f32 to vector<128x32xf32>
    %39 = arith.select %33, %35, %38 : vector<128x32xi1>, vector<128x32xf32>
    %cst_14 = arith.constant 1.000000e+00 : f32
    %cst_15 = arith.constant 0.000000e+00 : f32
    %40 = vector.broadcast %cst_14 : f32 to vector<128x32xf32>
    %41 = vector.broadcast %cst_15 : f32 to vector<128x32xf32>
    %42 = arith.select %33, %40, %41 : vector<128x32xi1>, vector<128x32xf32>
    %43 = tpu.concatenate %39, %42 in 1 : vector<128x32xf32>, vector<128x32xf32> -> vector<128x64xf32>
    %44 = arith.truncf %24 : vector<32x32xf32> to vector<32x32xbf16>
    %45 = arith.truncf %37 : vector<128x32xf32> to vector<128x32xbf16>
    %cst_16 = arith.constant dense<0.000000e+00> : vector<32x128xf32>
    %46 = tpu.matmul %44, %45, %cst_16 {dimension_numbers = #tpu.dot_dimension_numbers<[1], [1], [0], [0], [0, 0, 1, 0], [], []>} : vector<32x32xbf16>, vector<128x32xbf16>, vector<32x128xf32> -> vector<32x128xf32>
    %cst_17 = arith.constant 0.353553385 : f32
    %47 = vector.broadcast %cst_17 : f32 to vector<32x128xf32>
    %48 = arith.mulf %46, %47 : vector<32x128xf32>
    %49 = tpu.iota {dimensions = array<i32: 0>} : vector<32x128xi32>
    %c4_i32 = arith.constant 4 : i32
    %50 = vector.broadcast %c4_i32 : i32 to vector<32x128xi32>
    %51 = arith.shrsi %49, %50 : vector<32x128xi32>
    %52 = tpu.iota {dimensions = array<i32: 1>} : vector<32x128xi32>
    %c31_i32 = arith.constant 31 : i32
    %53 = vector.broadcast %c31_i32 : i32 to vector<32x128xi32>
    %54 = arith.andi %52, %53 : vector<32x128xi32>
    %c4_i32_18 = arith.constant 4 : i32
    %55 = vector.broadcast %c4_i32_18 : i32 to vector<32x128xi32>
    %56 = arith.shrsi %54, %55 : vector<32x128xi32>
    %57 = arith.cmpi eq, %51, %56 : vector<32x128xi32>
    %cst_19 = arith.constant -1.000000e+30 : f32
    %58 = vector.broadcast %cst_19 : f32 to vector<32x128xf32>
    %59 = arith.select %57, %48, %58 : vector<32x128xi1>, vector<32x128xf32>
    %cst_20 = arith.constant dense<0xFF800000> : vector<32xf32>
    %60 = vector.multi_reduction <maximumf>, %59, %cst_20 [1] : vector<32x128xf32> to vector<32xf32>
    %61 = vector.shape_cast %60 : vector<32xf32> to vector<32x1xf32>
    %62 = vector.broadcast %61 : vector<32x1xf32> to vector<32x128xf32>
    %63 = arith.subf %59, %62 : vector<32x128xf32>
    %64 = math.exp %63 : vector<32x128xf32>
    %65 = arith.truncf %64 : vector<32x128xf32> to vector<32x128xbf16>
    %66 = arith.truncf %43 : vector<128x64xf32> to vector<128x64xbf16>
    %cst_21 = arith.constant dense<0.000000e+00> : vector<32x64xf32>
    %67 = tpu.matmul %65, %66, %cst_21 {dimension_numbers = #tpu.dot_dimension_numbers<[1], [0], [0], [1], [0, 0, 1, 1], [], []>} : vector<32x128xbf16>, vector<128x64xbf16>, vector<32x64xf32> -> vector<32x64xf32>
    %68 = vector.extract_strided_slice %67 {offsets = [0, 0], sizes = [32, 32], strides = [1, 1]} : vector<32x64xf32> to vector<32x32xf32>
    %69 = vector.extract_strided_slice %67 {offsets = [0, 32], sizes = [32, 32], strides = [1, 1]} : vector<32x64xf32> to vector<32x32xf32>
    %70 = tpu.reciprocal %69 {approx = true} : vector<32x32xf32> -> vector<32x32xf32>
    %71 = arith.mulf %68, %70 : vector<32x32xf32>
    %72 = arith.truncf %71 : vector<32x32xf32> to vector<32x32xbf16>
    %c0_22 = arith.constant 0 : index
    %c0_23 = arith.constant 0 : index
    %c0_24 = arith.constant 0 : index
    %73 = vector.load %arg9[%c0_22, %c0_23, %c0_24] : memref<3x32x32xbf16, #tpu.memory_space<vmem>>, vector<1x32x32xbf16>
    %74 = vector.shape_cast %73 : vector<1x32x32xbf16> to vector<32x32xbf16>
    %cst_25 = arith.constant dense<0.000000e+00> : vector<32x32xf32>
    %75 = tpu.matmul %72, %74, %cst_25 {dimension_numbers = #tpu.dot_dimension_numbers<[1], [1], [0], [0], [0, 0, 1, 0], [], []>} : vector<32x32xbf16>, vector<32x32xbf16>, vector<32x32xf32> -> vector<32x32xf32>
    %c0_26 = arith.constant 0 : index
    %c0_27 = arith.constant 0 : index
    %76 = vector.load %arg10[%c0_26, %c0_27] : memref<3x32xf32, #tpu.memory_space<vmem>>, vector<1x32xf32>
    %77 = vector.broadcast %76 : vector<1x32xf32> to vector<32x32xf32>
    %78 = arith.addf %75, %77 : vector<32x32xf32>
    %79 = arith.addf %0, %78 : vector<32x32xf32>
    %cst_28 = arith.constant dense<0.000000e+00> : vector<16xf32>
    %80 = vector.multi_reduction <add>, %1, %cst_28 [1] : vector<16x32xf32> to vector<16xf32>
    %81 = vector.shape_cast %80 : vector<16xf32> to vector<16x1xf32>
    %cst_29 = arith.constant 3.200000e+01 : f32
    %82 = vector.broadcast %cst_29 : f32 to vector<16x1xf32>
    %83 = arith.divf %81, %82 : vector<16x1xf32>
    %84 = vector.broadcast %83 : vector<16x1xf32> to vector<16x32xf32>
    %85 = arith.subf %1, %84 : vector<16x32xf32>
    %86 = arith.mulf %85, %85 : vector<16x32xf32>
    %cst_30 = arith.constant dense<0.000000e+00> : vector<16xf32>
    %87 = vector.multi_reduction <add>, %86, %cst_30 [1] : vector<16x32xf32> to vector<16xf32>
    %88 = vector.shape_cast %87 : vector<16xf32> to vector<16x1xf32>
    %cst_31 = arith.constant 3.200000e+01 : f32
    %89 = vector.broadcast %cst_31 : f32 to vector<16x1xf32>
    %90 = arith.divf %88, %89 : vector<16x1xf32>
    %cst_32 = arith.constant 9.99999974E-6 : f32
    %91 = vector.broadcast %cst_32 : f32 to vector<16x1xf32>
    %92 = arith.addf %90, %91 : vector<16x1xf32>
    %93 = math.rsqrt %92 : vector<16x1xf32>
    %94 = vector.broadcast %93 : vector<16x1xf32> to vector<16x32xf32>
    %95 = arith.mulf %85, %94 : vector<16x32xf32>
    %96 = arith.truncf %95 : vector<16x32xf32> to vector<16x32xbf16>
    %c0_33 = arith.constant 0 : index
    %c0_34 = arith.constant 0 : index
    %97 = vector.load %arg5[%c0_33, %c0_34] : memref<96x32xbf16, #tpu.memory_space<vmem>>, vector<96x32xbf16>
    %cst_35 = arith.constant dense<0.000000e+00> : vector<16x96xf32>
    %98 = tpu.matmul %96, %97, %cst_35 {dimension_numbers = #tpu.dot_dimension_numbers<[1], [1], [0], [0], [0, 0, 1, 0], [], []>} : vector<16x32xbf16>, vector<96x32xbf16>, vector<16x96xf32> -> vector<16x96xf32>
    %c0_36 = arith.constant 0 : index
    %c0_37 = arith.constant 0 : index
    %99 = vector.load %arg6[%c0_36, %c0_37] : memref<1x96xf32, #tpu.memory_space<vmem>>, vector<1x96xf32>
    %100 = vector.broadcast %99 : vector<1x96xf32> to vector<16x96xf32>
    %101 = arith.addf %98, %100 : vector<16x96xf32>
    %102 = vector.extract_strided_slice %101 {offsets = [0, 0], sizes = [16, 32], strides = [1, 1]} : vector<16x96xf32> to vector<16x32xf32>
    %103 = vector.extract_strided_slice %101 {offsets = [0, 32], sizes = [16, 32], strides = [1, 1]} : vector<16x96xf32> to vector<16x32xf32>
    %104 = vector.extract_strided_slice %101 {offsets = [0, 64], sizes = [16, 32], strides = [1, 1]} : vector<16x96xf32> to vector<16x32xf32>
    %105 = tpu.iota {dimensions = array<i32: 0>} : vector<64x32xi32>
    %c4_i32_38 = arith.constant 4 : i32
    %106 = vector.broadcast %c4_i32_38 : i32 to vector<64x32xi32>
    %107 = arith.shrsi %105, %106 : vector<64x32xi32>
    %108 = tpu.iota {dimensions = array<i32: 1>} : vector<64x32xi32>
    %c3_i32_39 = arith.constant 3 : i32
    %109 = vector.broadcast %c3_i32_39 : i32 to vector<64x32xi32>
    %110 = arith.shrsi %108, %109 : vector<64x32xi32>
    %111 = arith.cmpi eq, %107, %110 : vector<64x32xi32>
    %112 = tpu.concatenate %103, %103, %103, %103 in 0 : vector<16x32xf32>, vector<16x32xf32>, vector<16x32xf32>, vector<16x32xf32> -> vector<64x32xf32>
    %113 = tpu.concatenate %104, %104, %104, %104 in 0 : vector<16x32xf32>, vector<16x32xf32>, vector<16x32xf32>, vector<16x32xf32> -> vector<64x32xf32>
    %cst_40 = arith.constant 0.000000e+00 : f32
    %114 = vector.broadcast %cst_40 : f32 to vector<64x32xf32>
    %115 = arith.select %111, %112, %114 : vector<64x32xi1>, vector<64x32xf32>
    %cst_41 = arith.constant 0.000000e+00 : f32
    %116 = vector.broadcast %cst_41 : f32 to vector<64x32xf32>
    %117 = arith.select %111, %113, %116 : vector<64x32xi1>, vector<64x32xf32>
    %cst_42 = arith.constant 1.000000e+00 : f32
    %cst_43 = arith.constant 0.000000e+00 : f32
    %118 = vector.broadcast %cst_42 : f32 to vector<64x32xf32>
    %119 = vector.broadcast %cst_43 : f32 to vector<64x32xf32>
    %120 = arith.select %111, %118, %119 : vector<64x32xi1>, vector<64x32xf32>
    %121 = tpu.concatenate %117, %120 in 1 : vector<64x32xf32>, vector<64x32xf32> -> vector<64x64xf32>
    %122 = arith.truncf %102 : vector<16x32xf32> to vector<16x32xbf16>
    %123 = arith.truncf %115 : vector<64x32xf32> to vector<64x32xbf16>
    %cst_44 = arith.constant dense<0.000000e+00> : vector<16x64xf32>
    %124 = tpu.matmul %122, %123, %cst_44 {dimension_numbers = #tpu.dot_dimension_numbers<[1], [1], [0], [0], [0, 0, 1, 0], [], []>} : vector<16x32xbf16>, vector<64x32xbf16>, vector<16x64xf32> -> vector<16x64xf32>
    %cst_45 = arith.constant 0.353553385 : f32
    %125 = vector.broadcast %cst_45 : f32 to vector<16x64xf32>
    %126 = arith.mulf %124, %125 : vector<16x64xf32>
    %127 = tpu.iota {dimensions = array<i32: 0>} : vector<16x64xi32>
    %c3_i32_46 = arith.constant 3 : i32
    %128 = vector.broadcast %c3_i32_46 : i32 to vector<16x64xi32>
    %129 = arith.shrsi %127, %128 : vector<16x64xi32>
    %130 = tpu.iota {dimensions = array<i32: 1>} : vector<16x64xi32>
    %c15_i32 = arith.constant 15 : i32
    %131 = vector.broadcast %c15_i32 : i32 to vector<16x64xi32>
    %132 = arith.andi %130, %131 : vector<16x64xi32>
    %c3_i32_47 = arith.constant 3 : i32
    %133 = vector.broadcast %c3_i32_47 : i32 to vector<16x64xi32>
    %134 = arith.shrsi %132, %133 : vector<16x64xi32>
    %135 = arith.cmpi eq, %129, %134 : vector<16x64xi32>
    %cst_48 = arith.constant -1.000000e+30 : f32
    %136 = vector.broadcast %cst_48 : f32 to vector<16x64xf32>
    %137 = arith.select %135, %126, %136 : vector<16x64xi1>, vector<16x64xf32>
    %cst_49 = arith.constant dense<0xFF800000> : vector<16xf32>
    %138 = vector.multi_reduction <maximumf>, %137, %cst_49 [1] : vector<16x64xf32> to vector<16xf32>
    %139 = vector.shape_cast %138 : vector<16xf32> to vector<16x1xf32>
    %140 = vector.broadcast %139 : vector<16x1xf32> to vector<16x64xf32>
    %141 = arith.subf %137, %140 : vector<16x64xf32>
    %142 = math.exp %141 : vector<16x64xf32>
    %143 = arith.truncf %142 : vector<16x64xf32> to vector<16x64xbf16>
    %144 = arith.truncf %121 : vector<64x64xf32> to vector<64x64xbf16>
    %cst_50 = arith.constant dense<0.000000e+00> : vector<16x64xf32>
    %145 = tpu.matmul %143, %144, %cst_50 {dimension_numbers = #tpu.dot_dimension_numbers<[1], [0], [0], [1], [0, 0, 1, 1], [], []>} : vector<16x64xbf16>, vector<64x64xbf16>, vector<16x64xf32> -> vector<16x64xf32>
    %146 = vector.extract_strided_slice %145 {offsets = [0, 0], sizes = [16, 32], strides = [1, 1]} : vector<16x64xf32> to vector<16x32xf32>
    %147 = vector.extract_strided_slice %145 {offsets = [0, 32], sizes = [16, 32], strides = [1, 1]} : vector<16x64xf32> to vector<16x32xf32>
    %148 = tpu.reciprocal %147 {approx = true} : vector<16x32xf32> -> vector<16x32xf32>
    %149 = arith.mulf %146, %148 : vector<16x32xf32>
    %150 = arith.truncf %149 : vector<16x32xf32> to vector<16x32xbf16>
    %c1 = arith.constant 1 : index
    %c0_51 = arith.constant 0 : index
    %c0_52 = arith.constant 0 : index
    %151 = vector.load %arg9[%c1, %c0_51, %c0_52] : memref<3x32x32xbf16, #tpu.memory_space<vmem>>, vector<1x32x32xbf16>
    %152 = vector.shape_cast %151 : vector<1x32x32xbf16> to vector<32x32xbf16>
    %cst_53 = arith.constant dense<0.000000e+00> : vector<16x32xf32>
    %153 = tpu.matmul %150, %152, %cst_53 {dimension_numbers = #tpu.dot_dimension_numbers<[1], [1], [0], [0], [0, 0, 1, 0], [], []>} : vector<16x32xbf16>, vector<32x32xbf16>, vector<16x32xf32> -> vector<16x32xf32>
    %c1_54 = arith.constant 1 : index
    %c0_55 = arith.constant 0 : index
    %154 = vector.load %arg10[%c1_54, %c0_55] : memref<3x32xf32, #tpu.memory_space<vmem>>, vector<1x32xf32>
    %155 = vector.broadcast %154 : vector<1x32xf32> to vector<16x32xf32>
    %156 = arith.addf %153, %155 : vector<16x32xf32>
    %cst_56 = arith.constant dense<0.000000e+00> : vector<16xf32>
    %157 = vector.multi_reduction <add>, %156, %cst_56 [1] : vector<16x32xf32> to vector<16xf32>
    %158 = vector.shape_cast %157 : vector<16xf32> to vector<16x1xf32>
    %cst_57 = arith.constant 3.200000e+01 : f32
    %159 = vector.broadcast %cst_57 : f32 to vector<16x1xf32>
    %160 = arith.divf %158, %159 : vector<16x1xf32>
    %161 = vector.broadcast %160 : vector<16x1xf32> to vector<16x32xf32>
    %162 = arith.subf %156, %161 : vector<16x32xf32>
    %163 = arith.mulf %162, %162 : vector<16x32xf32>
    %cst_58 = arith.constant dense<0.000000e+00> : vector<16xf32>
    %164 = vector.multi_reduction <add>, %163, %cst_58 [1] : vector<16x32xf32> to vector<16xf32>
    %165 = vector.shape_cast %164 : vector<16xf32> to vector<16x1xf32>
    %cst_59 = arith.constant 3.200000e+01 : f32
    %166 = vector.broadcast %cst_59 : f32 to vector<16x1xf32>
    %167 = arith.divf %165, %166 : vector<16x1xf32>
    %cst_60 = arith.constant 9.99999974E-6 : f32
    %168 = vector.broadcast %cst_60 : f32 to vector<16x1xf32>
    %169 = arith.addf %167, %168 : vector<16x1xf32>
    %170 = math.rsqrt %169 : vector<16x1xf32>
    %171 = vector.broadcast %170 : vector<16x1xf32> to vector<16x32xf32>
    %172 = arith.mulf %162, %171 : vector<16x32xf32>
    %173 = arith.truncf %172 : vector<16x32xf32> to vector<16x32xbf16>
    %c0_61 = arith.constant 0 : index
    %c0_62 = arith.constant 0 : index
    %174 = vector.load %arg7[%c0_61, %c0_62] : memref<32x32xbf16, #tpu.memory_space<vmem>>, vector<32x32xbf16>
    %cst_63 = arith.constant dense<0.000000e+00> : vector<16x32xf32>
    %175 = tpu.matmul %173, %174, %cst_63 {dimension_numbers = #tpu.dot_dimension_numbers<[1], [1], [0], [0], [0, 0, 1, 0], [], []>} : vector<16x32xbf16>, vector<32x32xbf16>, vector<16x32xf32> -> vector<16x32xf32>
    %c0_64 = arith.constant 0 : index
    %c0_65 = arith.constant 0 : index
    %176 = vector.load %arg8[%c0_64, %c0_65] : memref<1x32xf32, #tpu.memory_space<vmem>>, vector<1x32xf32>
    %177 = vector.broadcast %176 : vector<1x32xf32> to vector<16x32xf32>
    %178 = arith.addf %175, %177 : vector<16x32xf32>
    %179 = vector.extract_strided_slice %23 {offsets = [0, 96], sizes = [32, 32], strides = [1, 1]} : vector<32x160xf32> to vector<32x32xf32>
    %180 = vector.extract_strided_slice %23 {offsets = [0, 128], sizes = [32, 32], strides = [1, 1]} : vector<32x160xf32> to vector<32x32xf32>
    %181 = tpu.iota {dimensions = array<i32: 0>} : vector<128x32xi32>
    %c5_i32_66 = arith.constant 5 : i32
    %182 = vector.broadcast %c5_i32_66 : i32 to vector<128x32xi32>
    %183 = arith.shrsi %181, %182 : vector<128x32xi32>
    %184 = tpu.iota {dimensions = array<i32: 1>} : vector<128x32xi32>
    %c3_i32_67 = arith.constant 3 : i32
    %185 = vector.broadcast %c3_i32_67 : i32 to vector<128x32xi32>
    %186 = arith.shrsi %184, %185 : vector<128x32xi32>
    %187 = arith.cmpi eq, %183, %186 : vector<128x32xi32>
    %188 = tpu.concatenate %179, %179, %179, %179 in 0 : vector<32x32xf32>, vector<32x32xf32>, vector<32x32xf32>, vector<32x32xf32> -> vector<128x32xf32>
    %189 = tpu.concatenate %180, %180, %180, %180 in 0 : vector<32x32xf32>, vector<32x32xf32>, vector<32x32xf32>, vector<32x32xf32> -> vector<128x32xf32>
    %cst_68 = arith.constant 0.000000e+00 : f32
    %190 = vector.broadcast %cst_68 : f32 to vector<128x32xf32>
    %191 = arith.select %187, %188, %190 : vector<128x32xi1>, vector<128x32xf32>
    %cst_69 = arith.constant 0.000000e+00 : f32
    %192 = vector.broadcast %cst_69 : f32 to vector<128x32xf32>
    %193 = arith.select %187, %189, %192 : vector<128x32xi1>, vector<128x32xf32>
    %cst_70 = arith.constant 1.000000e+00 : f32
    %cst_71 = arith.constant 0.000000e+00 : f32
    %194 = vector.broadcast %cst_70 : f32 to vector<128x32xf32>
    %195 = vector.broadcast %cst_71 : f32 to vector<128x32xf32>
    %196 = arith.select %187, %194, %195 : vector<128x32xi1>, vector<128x32xf32>
    %197 = tpu.concatenate %193, %196 in 1 : vector<128x32xf32>, vector<128x32xf32> -> vector<128x64xf32>
    %198 = arith.truncf %178 : vector<16x32xf32> to vector<16x32xbf16>
    %199 = arith.truncf %191 : vector<128x32xf32> to vector<128x32xbf16>
    %cst_72 = arith.constant dense<0.000000e+00> : vector<16x128xf32>
    %200 = tpu.matmul %198, %199, %cst_72 {dimension_numbers = #tpu.dot_dimension_numbers<[1], [1], [0], [0], [0, 0, 1, 0], [], []>} : vector<16x32xbf16>, vector<128x32xbf16>, vector<16x128xf32> -> vector<16x128xf32>
    %cst_73 = arith.constant 0.353553385 : f32
    %201 = vector.broadcast %cst_73 : f32 to vector<16x128xf32>
    %202 = arith.mulf %200, %201 : vector<16x128xf32>
    %203 = tpu.iota {dimensions = array<i32: 0>} : vector<16x128xi32>
    %c3_i32_74 = arith.constant 3 : i32
    %204 = vector.broadcast %c3_i32_74 : i32 to vector<16x128xi32>
    %205 = arith.shrsi %203, %204 : vector<16x128xi32>
    %206 = tpu.iota {dimensions = array<i32: 1>} : vector<16x128xi32>
    %c31_i32_75 = arith.constant 31 : i32
    %207 = vector.broadcast %c31_i32_75 : i32 to vector<16x128xi32>
    %208 = arith.andi %206, %207 : vector<16x128xi32>
    %c4_i32_76 = arith.constant 4 : i32
    %209 = vector.broadcast %c4_i32_76 : i32 to vector<16x128xi32>
    %210 = arith.shrsi %208, %209 : vector<16x128xi32>
    %211 = arith.cmpi eq, %205, %210 : vector<16x128xi32>
    %cst_77 = arith.constant -1.000000e+30 : f32
    %212 = vector.broadcast %cst_77 : f32 to vector<16x128xf32>
    %213 = arith.select %211, %202, %212 : vector<16x128xi1>, vector<16x128xf32>
    %cst_78 = arith.constant dense<0xFF800000> : vector<16xf32>
    %214 = vector.multi_reduction <maximumf>, %213, %cst_78 [1] : vector<16x128xf32> to vector<16xf32>
    %215 = vector.shape_cast %214 : vector<16xf32> to vector<16x1xf32>
    %216 = vector.broadcast %215 : vector<16x1xf32> to vector<16x128xf32>
    %217 = arith.subf %213, %216 : vector<16x128xf32>
    %218 = math.exp %217 : vector<16x128xf32>
    %219 = arith.truncf %218 : vector<16x128xf32> to vector<16x128xbf16>
    %220 = arith.truncf %197 : vector<128x64xf32> to vector<128x64xbf16>
    %cst_79 = arith.constant dense<0.000000e+00> : vector<16x64xf32>
    %221 = tpu.matmul %219, %220, %cst_79 {dimension_numbers = #tpu.dot_dimension_numbers<[1], [0], [0], [1], [0, 0, 1, 1], [], []>} : vector<16x128xbf16>, vector<128x64xbf16>, vector<16x64xf32> -> vector<16x64xf32>
    %222 = vector.extract_strided_slice %221 {offsets = [0, 0], sizes = [16, 32], strides = [1, 1]} : vector<16x64xf32> to vector<16x32xf32>
    %223 = vector.extract_strided_slice %221 {offsets = [0, 32], sizes = [16, 32], strides = [1, 1]} : vector<16x64xf32> to vector<16x32xf32>
    %224 = tpu.reciprocal %223 {approx = true} : vector<16x32xf32> -> vector<16x32xf32>
    %225 = arith.mulf %222, %224 : vector<16x32xf32>
    %226 = arith.truncf %225 : vector<16x32xf32> to vector<16x32xbf16>
    %c2 = arith.constant 2 : index
    %c0_80 = arith.constant 0 : index
    %c0_81 = arith.constant 0 : index
    %227 = vector.load %arg9[%c2, %c0_80, %c0_81] : memref<3x32x32xbf16, #tpu.memory_space<vmem>>, vector<1x32x32xbf16>
    %228 = vector.shape_cast %227 : vector<1x32x32xbf16> to vector<32x32xbf16>
    %cst_82 = arith.constant dense<0.000000e+00> : vector<16x32xf32>
    %229 = tpu.matmul %226, %228, %cst_82 {dimension_numbers = #tpu.dot_dimension_numbers<[1], [1], [0], [0], [0, 0, 1, 0], [], []>} : vector<16x32xbf16>, vector<32x32xbf16>, vector<16x32xf32> -> vector<16x32xf32>
    %c2_83 = arith.constant 2 : index
    %c0_84 = arith.constant 0 : index
    %230 = vector.load %arg10[%c2_83, %c0_84] : memref<3x32xf32, #tpu.memory_space<vmem>>, vector<1x32xf32>
    %231 = vector.broadcast %230 : vector<1x32xf32> to vector<16x32xf32>
    %232 = arith.addf %229, %231 : vector<16x32xf32>
    %233 = arith.addf %1, %232 : vector<16x32xf32>
    %234 = tpu.concatenate %79, %233 in 0 : vector<32x32xf32>, vector<16x32xf32> -> vector<48x32xf32>
    %cst_85 = arith.constant dense<0.000000e+00> : vector<48xf32>
    %235 = vector.multi_reduction <add>, %234, %cst_85 [1] : vector<48x32xf32> to vector<48xf32>
    %236 = vector.shape_cast %235 : vector<48xf32> to vector<48x1xf32>
    %cst_86 = arith.constant 3.200000e+01 : f32
    %237 = vector.broadcast %cst_86 : f32 to vector<48x1xf32>
    %238 = arith.divf %236, %237 : vector<48x1xf32>
    %239 = vector.broadcast %238 : vector<48x1xf32> to vector<48x32xf32>
    %240 = arith.subf %234, %239 : vector<48x32xf32>
    %241 = arith.mulf %240, %240 : vector<48x32xf32>
    %cst_87 = arith.constant dense<0.000000e+00> : vector<48xf32>
    %242 = vector.multi_reduction <add>, %241, %cst_87 [1] : vector<48x32xf32> to vector<48xf32>
    %243 = vector.shape_cast %242 : vector<48xf32> to vector<48x1xf32>
    %cst_88 = arith.constant 3.200000e+01 : f32
    %244 = vector.broadcast %cst_88 : f32 to vector<48x1xf32>
    %245 = arith.divf %243, %244 : vector<48x1xf32>
    %cst_89 = arith.constant 9.99999974E-6 : f32
    %246 = vector.broadcast %cst_89 : f32 to vector<48x1xf32>
    %247 = arith.addf %245, %246 : vector<48x1xf32>
    %248 = math.rsqrt %247 : vector<48x1xf32>
    %249 = vector.broadcast %248 : vector<48x1xf32> to vector<48x32xf32>
    %250 = arith.mulf %240, %249 : vector<48x32xf32>
    %c0_90 = arith.constant 0 : index
    %c0_91 = arith.constant 0 : index
    %251 = vector.load %arg15[%c0_90, %c0_91] : memref<1x32xf32, #tpu.memory_space<vmem>>, vector<1x32xf32>
    %252 = vector.broadcast %251 : vector<1x32xf32> to vector<48x32xf32>
    %253 = arith.mulf %250, %252 : vector<48x32xf32>
    %c0_92 = arith.constant 0 : index
    %c0_93 = arith.constant 0 : index
    %254 = vector.load %arg16[%c0_92, %c0_93] : memref<1x32xf32, #tpu.memory_space<vmem>>, vector<1x32xf32>
    %255 = vector.broadcast %254 : vector<1x32xf32> to vector<48x32xf32>
    %256 = arith.addf %253, %255 : vector<48x32xf32>
    %257 = arith.truncf %256 : vector<48x32xf32> to vector<48x32xbf16>
    %c0_94 = arith.constant 0 : index
    %c0_95 = arith.constant 0 : index
    %258 = vector.load %arg11[%c0_94, %c0_95] : memref<128x32xbf16, #tpu.memory_space<vmem>>, vector<128x32xbf16>
    %cst_96 = arith.constant dense<0.000000e+00> : vector<48x128xf32>
    %259 = tpu.matmul %257, %258, %cst_96 {dimension_numbers = #tpu.dot_dimension_numbers<[1], [1], [0], [0], [0, 0, 1, 0], [], []>} : vector<48x32xbf16>, vector<128x32xbf16>, vector<48x128xf32> -> vector<48x128xf32>
    %c0_97 = arith.constant 0 : index
    %c0_98 = arith.constant 0 : index
    %260 = vector.load %arg12[%c0_97, %c0_98] : memref<1x128xf32, #tpu.memory_space<vmem>>, vector<1x128xf32>
    %261 = vector.broadcast %260 : vector<1x128xf32> to vector<48x128xf32>
    %262 = arith.addf %259, %261 : vector<48x128xf32>
    %cst_99 = arith.constant 5.000000e-01 : f32
    %263 = vector.broadcast %cst_99 : f32 to vector<48x128xf32>
    %264 = arith.mulf %263, %262 : vector<48x128xf32>
    %cst_100 = arith.constant 4.471500e-02 : f32
    %265 = vector.broadcast %cst_100 : f32 to vector<48x128xf32>
    %266 = arith.mulf %265, %262 : vector<48x128xf32>
    %267 = arith.mulf %266, %262 : vector<48x128xf32>
    %268 = arith.mulf %267, %262 : vector<48x128xf32>
    %269 = arith.addf %262, %268 : vector<48x128xf32>
    %cst_101 = arith.constant 0.797884583 : f32
    %270 = vector.broadcast %cst_101 : f32 to vector<48x128xf32>
    %271 = arith.mulf %270, %269 : vector<48x128xf32>
    %272 = math.tanh %271 : vector<48x128xf32>
    %cst_102 = arith.constant 1.000000e+00 : f32
    %273 = vector.broadcast %cst_102 : f32 to vector<48x128xf32>
    %274 = arith.addf %273, %272 : vector<48x128xf32>
    %275 = arith.mulf %264, %274 : vector<48x128xf32>
    %276 = arith.truncf %275 : vector<48x128xf32> to vector<48x128xbf16>
    %c0_103 = arith.constant 0 : index
    %c0_104 = arith.constant 0 : index
    %277 = vector.load %arg13[%c0_103, %c0_104] : memref<32x128xbf16, #tpu.memory_space<vmem>>, vector<32x128xbf16>
    %cst_105 = arith.constant dense<0.000000e+00> : vector<48x32xf32>
    %278 = tpu.matmul %276, %277, %cst_105 {dimension_numbers = #tpu.dot_dimension_numbers<[1], [1], [0], [0], [0, 0, 1, 0], [], []>} : vector<48x128xbf16>, vector<32x128xbf16>, vector<48x32xf32> -> vector<48x32xf32>
    %279 = arith.addf %256, %278 : vector<48x32xf32>
    %c0_106 = arith.constant 0 : index
    %c0_107 = arith.constant 0 : index
    %280 = vector.load %arg14[%c0_106, %c0_107] : memref<1x32xf32, #tpu.memory_space<vmem>>, vector<1x32xf32>
    %281 = vector.broadcast %280 : vector<1x32xf32> to vector<48x32xf32>
    %282 = arith.addf %279, %281 : vector<48x32xf32>
    %c0_108 = arith.constant 0 : index
    %c0_109 = arith.constant 0 : index
    %283 = vector.load %arg17[%c0_108, %c0_109] : memref<48x32xf32, #tpu.memory_space<vmem>>, vector<48x32xf32>
    tpu.vector_store %arg17[%c0_108, %c0_109], %282 {strides = array<i32>} : memref<48x32xf32, #tpu.memory_space<vmem>>, vector<48x32xf32>,
    return
  }
  func.func @transform_0(%arg0: i32) -> (i32, i32) {
    %c0_i32 = arith.constant 0 : i32
    %c0_i32_0 = arith.constant 0 : i32
    %c0_i32_1 = arith.constant 0 : i32
    return %c0_i32, %c0_i32_0 : i32, i32
  }
  func.func @transform_1(%arg0: i32) -> (i32, i32) {
    %c0_i32 = arith.constant 0 : i32
    %c0_i32_0 = arith.constant 0 : i32
    %c0_i32_1 = arith.constant 0 : i32
    return %c0_i32, %c0_i32_0 : i32, i32
  }
  func.func @transform_2(%arg0: i32) -> (i32, i32) {
    %c0_i32 = arith.constant 0 : i32
    %c0_i32_0 = arith.constant 0 : i32
    %c0_i32_1 = arith.constant 0 : i32
    return %c0_i32, %c0_i32_0 : i32, i32
  }
  func.func @transform_3(%arg0: i32) -> (i32, i32) {
    %c0_i32 = arith.constant 0 : i32
    %c0_i32_0 = arith.constant 0 : i32
    %c0_i32_1 = arith.constant 0 : i32
    return %c0_i32, %c0_i32_0 : i32, i32
  }
  func.func @transform_4(%arg0: i32) -> (i32, i32) {
    %c0_i32 = arith.constant 0 : i32
    %c0_i32_0 = arith.constant 0 : i32
    %c0_i32_1 = arith.constant 0 : i32
    return %c0_i32, %c0_i32_0 : i32, i32
  }
  func.func @transform_5(%arg0: i32) -> (i32, i32) {
    %c0_i32 = arith.constant 0 : i32
    %c0_i32_0 = arith.constant 0 : i32
    %c0_i32_1 = arith.constant 0 : i32
    return %c0_i32, %c0_i32_0 : i32, i32
  }
  func.func @transform_6(%arg0: i32) -> (i32, i32) {
    %c0_i32 = arith.constant 0 : i32
    %c0_i32_0 = arith.constant 0 : i32
    %c0_i32_1 = arith.constant 0 : i32
    return %c0_i32, %c0_i32_0 : i32, i32
  }
  func.func @transform_7(%arg0: i32) -> (i32, i32) {
    %c0_i32 = arith.constant 0 : i32
    %c0_i32_0 = arith.constant 0 : i32
    %c0_i32_1 = arith.constant 0 : i32
    return %c0_i32, %c0_i32_0 : i32, i32
  }
  func.func @transform_8(%arg0: i32) -> (i32, i32, i32) {
    %c0_i32 = arith.constant 0 : i32
    %c0_i32_0 = arith.constant 0 : i32
    %c0_i32_1 = arith.constant 0 : i32
    %c0_i32_2 = arith.constant 0 : i32
    return %c0_i32, %c0_i32_0, %c0_i32_1 : i32, i32, i32
  }
  func.func @transform_9(%arg0: i32) -> (i32, i32) {
    %c0_i32 = arith.constant 0 : i32
    %c0_i32_0 = arith.constant 0 : i32
    %c0_i32_1 = arith.constant 0 : i32
    return %c0_i32, %c0_i32_0 : i32, i32
  }
  func.func @transform_10(%arg0: i32) -> (i32, i32) {
    %c0_i32 = arith.constant 0 : i32
    %c0_i32_0 = arith.constant 0 : i32
    %c0_i32_1 = arith.constant 0 : i32
    return %c0_i32, %c0_i32_0 : i32, i32
  }
  func.func @transform_11(%arg0: i32) -> (i32, i32) {
    %c0_i32 = arith.constant 0 : i32
    %c0_i32_0 = arith.constant 0 : i32
    %c0_i32_1 = arith.constant 0 : i32
    return %c0_i32, %c0_i32_0 : i32, i32
  }
  func.func @transform_12(%arg0: i32) -> (i32, i32) {
    %c0_i32 = arith.constant 0 : i32
    %c0_i32_0 = arith.constant 0 : i32
    %c0_i32_1 = arith.constant 0 : i32
    return %c0_i32, %c0_i32_0 : i32, i32
  }
  func.func @transform_13(%arg0: i32) -> (i32, i32) {
    %c0_i32 = arith.constant 0 : i32
    %c0_i32_0 = arith.constant 0 : i32
    %c0_i32_1 = arith.constant 0 : i32
    return %c0_i32, %c0_i32_0 : i32, i32
  }
  func.func @transform_14(%arg0: i32) -> (i32, i32) {
    %c0_i32 = arith.constant 0 : i32
    %c0_i32_0 = arith.constant 0 : i32
    %c0_i32_1 = arith.constant 0 : i32
    return %c0_i32, %c0_i32_0 : i32, i32
  }
  func.func @transform_15(%arg0: i32) -> (i32, i32) {
    %c0_i32 = arith.constant 0 : i32
    %c0_i32_0 = arith.constant 0 : i32
    %c0_i32_1 = arith.constant 0 : i32
    return %c0_i32, %c0_i32_0 : i32, i32
  }
  func.func @transform_16(%arg0: i32) -> (i32, i32) {
    %c0_i32 = arith.constant 0 : i32
    %c0_i32_0 = arith.constant 0 : i32
    %c0_i32_1 = arith.constant 0 : i32
    return %c0_i32, %c0_i32_0 : i32, i32
  }
}

</mosaic_0001>

<bundles_post_ra>
// kernel: squeeze.13
= control target key start
LH: loop header
LB: loop body
LE: loop exit
PB: predicated region body
PF: predicated region fallthrough
CT: control target
= control target key end

     0   :  { %vm7_vm0 = vcmask 261120   ;;  %s30_s8 = smov 32   ;;  %vm13_vm1 = vcmask 785920   ;;  %vm19_vm2 = vcmask 523520   ;;  %s47_s0 = inlined_call_operand.vmem [shape: f32[1,3,32], index: 0, kind: input, shape index: {}]   ;;  %s48_s1 = inlined_call_operand.vmem [shape: f32[96], index: 1, kind: output, shape index: {}]  }
   0x1   :  { %v4_v0 = vld [vmem:[%s47_s0] sm:$0xf]  ;;  %s29_s0 = smov 64  }
   0x2   :  { %5 = vst [vmem:[#allocation1] sm:$0xf] %v4_v0 }
   0x9   :  { %v10_v1 = vld [vmem:[#allocation1 + $0x2] sm:$0x1]   ;;  %v6_v2 = vld [vmem:[#allocation1] sm:$0x1]   ;;  %v16_v3 = vld [vmem:[#allocation1 + $0x1] sm:$0x1]  }
   0xa   :  { %11 = vrot.lane.b32.xlu0 %v10_v1, %s29_s0  ;;  %8 = vst.msk [vmem:[#allocation0] sm:$0x1] %vm7_vm0, %v6_v2  }
   0xe   :  { %17 = vrot.lane.b32.xlu0 %v16_v3, %s30_s8 }
  0x7c   :  { %v12_v4 = vpop.permute.xlu0 %11  }
  0x7d   :  { %14 = vst.msk [vmem:[#allocation0] sm:$0x1] %vm13_vm1, %v12_v4  }
  0x80   :  { %v18_v5 = vpop.permute.xlu0 %17  }
  0x81   :  { %20 = vst.msk [vmem:[#allocation0] sm:$0x1] %vm19_vm2, %v18_v5  }
  0x88   :  { %v24_v6 = vld [vmem:[#allocation0] sm:$0x1] }
  0x89   :  { %26 = vst [vmem:[%s48_s1] sm:$0x1] %v24_v6 }

// kernel: squeeze.22
= control target key start
LH: loop header
LB: loop body
LE: loop exit
PB: predicated region body
PF: predicated region fallthrough
CT: control target
= control target key end

     0   :  { %vm7_vm0 = vcmask 261120   ;;  %vm13_vm1 = vcmask 523520   ;;  %s39_s0 = inlined_call_operand.vmem [shape: f32[1,2,32], index: 0, kind: input, shape index: {}]   ;;  %s40_s1 = inlined_call_operand.vmem [shape: f32[64], index: 1, kind: output, shape index: {}]  }
   0x1   :  { %v4_v0 = vld [vmem:[%s39_s0] sm:$0x3]  ;;  %s22_s0 = smov 32  }
   0x2   :  { %5 = vst [vmem:[#allocation1] sm:$0x3] %v4_v0 }
   0x9   :  { %v10_v1 = vld [vmem:[#allocation1 + $0x1] sm:$0x1]   ;;  %v6_v2 = vld [vmem:[#allocation1] sm:$0x1]  }
   0xa   :  { %11 = vrot.lane.b32.xlu0 %v10_v1, %s22_s0  ;;  %8 = vst.msk [vmem:[#allocation0] sm:$0x1] %vm7_vm0, %v6_v2  }
  0x7c   :  { %v12_v3 = vpop.permute.xlu0 %11  }
  0x7d   :  { %14 = vst.msk [vmem:[#allocation0] sm:$0x1] %vm13_vm1, %v12_v3  }
  0x84   :  { %v18_v4 = vld [vmem:[#allocation0] sm:$0x1] }
  0x85   :  { %20 = vst [vmem:[%s40_s1] sm:$0x1] %v18_v4 }

// kernel: lt_vit_block.1
= control target key start
LH: loop header
LB: loop body
LE: loop exit
PB: predicated region body
PF: predicated region fallthrough
CT: control target
= control target key end

     0   :  { %vm4020_vm0 = vcmask 261120   ;;  %v2615_v8 = vmov 0   ;;  %s2618_s22 = smov 32   ;;  %s2619_s24 = smov 64   ;;  %s3982_s0 = inlined_call_operand.vmem [shape: f32[32,32], index: 0, kind: input, shape index: {}]   ;;  %s3983_s2 = inlined_call_operand.vmem [shape: bf16[160,32], index: 2, kind: input, shape index: {}]   ;;  %s3984_s3 = inlined_call_operand.vmem [shape: f32[1,160], index: 3, kind: input, shape index: {}]   ;;  %s3985_s1 = inlined_call_operand.vmem [shape: f32[16,32], index: 1, kind: input, shape index: {}]   ;;  %s3986_s8 = inlined_call_operand.vmem [shape: bf16[3,32,32], index: 8, kind: input, shape index: {}]   ;;  %s3987_s4 = inlined_call_operand.vmem [shape: bf16[96,32], index: 4, kind: input, shape index: {}]   ;;  %s3988_s5 = inlined_call_operand.vmem [shape: f32[1,96], index: 5, kind: input, shape index: {}]   ;;  %s3989_s9 = inlined_call_operand.vmem [shape: f32[3,32], index: 9, kind: input, shape index: {}]   ;;  %s3990_s6 = inlined_call_operand.vmem [shape: bf16[32,32], index: 6, kind: input, shape index: {}]   ;;  %s3991_s7 = inlined_call_operand.vmem [shape: f32[1,32], index: 7, kind: input, shape index: {}]   ;;  %s3992_s10 = inlined_call_operand.vmem [shape: bf16[128,32], index: 10, kind: input, shape index: {}]   ;;  %s3993_s14 = inlined_call_operand.vmem [shape: f32[1,32], index: 14, kind: input, shape index: {}]   ;;  %s3994_s15 = inlined_call_operand.vmem [shape: f32[1,32], index: 15, kind: input, shape index: {}]   ;;  %s3995_s12 = inlined_call_operand.vmem [shape: bf16[32,128], index: 12, kind: input, shape index: {}]   ;;  %s3996_s11 = inlined_call_operand.vmem [shape: f32[1,128], index: 11, kind: input, shape index: {}]   ;;  %s3997_s13 = inlined_call_operand.vmem [shape: f32[1,32], index: 13, kind: input, shape index: {}]   ;;  %s3998_s16 = inlined_call_operand.vmem [shape: f32[48,32], index: 16, kind: output, shape index: {}]  }
   0x1   :  { %4039 = sst [smem:[#allocation9_spill]] %s3982_s0  ;;  %234 = vmatprep.subr.bf16.mxu0 %v2615_v8  ;;  %v2503_v9 = vld [vmem:[%s3983_s2] sm:$0xff]   ;;  %266 = vmatprep.mubr.bf16.mxu0 %v2615_v8  ;;  %v2504_v11 = vld [vmem:[%s3983_s2 + $0x8] sm:$0xff]   ;;  %v2505_v13 = vld [vmem:[%s3983_s2 + $0x10] sm:$0xff]  }
   0x2   :  { %s4040_s23 = sld [smem:[#allocation9_spill]]  ;;  %v205_v10 = vsel %vm4020_vm0, %v2503_v9, 0  ;;  %v208_v12 = vsel %vm4020_vm0, %v2504_v11, 0  ;;  %v211_v14 = vsel %vm4020_vm0, %v2505_v13, 0  ;;  %v2506_v15 = vld [vmem:[%s3983_s2 + $0x18] sm:$0xff]   ;;  %v2507_v17 = vld [vmem:[%s3983_s2 + $0x20] sm:$0xff]  }
   0x3   :  { %235 = vmatpush1.bf16.xpose.msra.mxu0 %v205_v10  ;;  %v214_v16 = vsel %vm4020_vm0, %v2506_v15, 0  ;;  %v217_v18 = vsel %vm4020_vm0, %v2507_v17, 0  ;;  %v2508_v19 = vld [vmem:[%s3983_s2 + $0x28] sm:$0xff]   ;;  %v2509_v21 = vld [vmem:[%s3983_s2 + $0x30] sm:$0xff]   ;;  %v2510_v43 = vld [vmem:[%s3983_s2 + $0x38] sm:$0xff]  }
   0x4   :  { %236 = vmatprep.subr.bf16.mxu0 %v2615_v8  ;;  %v220_v20 = vsel %vm4020_vm0, %v2508_v19, 0  ;;  %v223_v22 = vsel %vm4020_vm0, %v2509_v21, 0  ;;  %v226_v44 = vsel %vm4020_vm0, %v2510_v43, 0  ;;  %v2511_v45 = vld [vmem:[%s3983_s2 + $0x40] sm:$0xff]   ;;  %v2512_v47 = vld [vmem:[%s3983_s2 + $0x48] sm:$0xff]  }
   0x5   :  { %v229_v46 = vsel %vm4020_vm0, %v2511_v45, 0  ;;  %v232_v48 = vsel %vm4020_vm0, %v2512_v47, 0 }
   0x8   :  { %v54_v0 = vld [vmem:[%s4040_s23] sm:$0xff]  ;;  %v56_v1 = vld [vmem:[%s4040_s23 + $0x10] sm:$0xff]  ;;  %v55_v2 = vld [vmem:[%s4040_s23 + $0x8] sm:$0xff] }
   0x9   :  { %v61_v3 = vsel %vm4020_vm0, %v54_v0, 0.0  ;;  %v67_v4 = vsel %vm4020_vm0, %v56_v1, 0.0  ;;  %v57_v5 = vld [vmem:[%s4040_s23 + $0x18] sm:$0xff]  ;;  %v64_v6 = vsel %vm4020_vm0, %v55_v2, 0.0 }
   0xa   :  { %62 = vadd.xlane.f32.xlu0 %v61_v3  ;;  %68 = vadd.xlane.f32.xlu1 %v67_v4  ;;  %v70_v7 = vsel %vm4020_vm0, %v57_v5, 0.0 }
   0xb   :  { %237 = vmatpush1.bf16.xpose.msra.mxu0 %v208_v12 }
   0xc   :  { %238 = vmatprep.subr.bf16.mxu0 %v2615_v8 }
   0xe   :  { %65 = vadd.xlane.f32.xlu0 %v64_v6  ;;  %71 = vadd.xlane.f32.xlu1 %v70_v7  ;;  %v138_v7 = vlaneseq }
  0x10   :  { %v2780_v9 = vshrl.u32 %v138_v7, 7  ;;  %v2789_v13 = vand.u32 127, %v138_v7 }
  0x12   :  { %v2783_v10 = vadd.s32 16, %v2780_v9  ;;  %v2786_v11 = vadd.s32 24, %v2780_v9  ;;  %v140_v12 = vsub.s32 0, %v2780_v9  ;;  %v2802_v17 = vadd.s32 56, %v2780_v9 }
  0x13   :  { %239 = vmatpush1.bf16.xpose.msra.mxu0 %v211_v14  ;;  %v2797_v14 = vadd.s32 48, %v2780_v9  ;;  %v2806_v19 = vshra.s32 %v2789_v13, 3  ;;  %v2857_v47 = vadd.s32 32, %v2780_v9 }
  0x14   :  { %240 = vmatprep.subr.bf16.mxu0 %v2615_v8  ;;  %v306_v15 = vshra.s32 %v2783_v10, 5 }
  0x15   :  { %v310_v21 = vshra.s32 %v2797_v14, 5 }
  0x16   :  { %vm2812_vm1 = vcmp.eq.s32.totalorder %v306_v15, %v2806_v19 }
  0x17   :  { %vm2833_vm3 = vcmp.eq.s32.totalorder %v310_v21, %v2806_v19 }
  0x1b   :  { %241 = vmatpush1.bf16.xpose.msra.mxu0 %v214_v16  ;;  %v307_v16 = vshra.s32 %v2786_v11, 5 }
  0x1c   :  { %242 = vmatprep.subr.bf16.mxu0 %v2615_v8 }
  0x1d   :  { %vm2817_vm2 = vcmp.eq.s32.totalorder %v307_v16, %v2806_v19 }
  0x23   :  { %243 = vmatpush1.bf16.xpose.msra.mxu0 %v217_v18 }
  0x24   :  { %244 = vmatprep.subr.bf16.mxu0 %v2615_v8 }
  0x2b   :  { %245 = vmatpush1.bf16.xpose.msra.mxu0 %v220_v20 }
  0x2c   :  { %246 = vmatprep.subr.bf16.mxu0 %v2615_v8 }
  0x33   :  { %247 = vmatpush1.bf16.xpose.msra.mxu0 %v223_v22 }
  0x34   :  { %248 = vmatprep.subr.bf16.mxu0 %v2615_v8 }
  0x3b   :  { %249 = vmatpush1.bf16.xpose.msra.mxu0 %v226_v44 }
  0x3c   :  { %250 = vmatprep.subr.bf16.mxu0 %v2615_v8 }
  0x43   :  { %251 = vmatpush1.bf16.xpose.msra.mxu0 %v229_v46 }
  0x44   :  { %252 = vmatprep.subr.bf16.mxu0 %v2615_v8 }
  0x4b   :  { %253 = vmatpush1.bf16.xpose.msra.mxu0 %v232_v48 }
  0x97   :  { %v63_v23 = vpop.xlane.xlu0 %62  ;;  %v69_v24 = vpop.xlane.xlu1 %68 }
  0x98   :  { %v74_v25 = vmul.f32 0.03125, %v63_v23  ;;  %v76_v26 = vmul.f32 0.03125, %v69_v24 }
  0x9a   :  { %v78_v27 = vsub.f32 %v54_v0, %v74_v25  ;;  %v80_v28 = vsub.f32 %v56_v1, %v76_v26  ;;  %v311_v25 = vshra.s32 %v2802_v17, 5 }
  0x9b   :  { %v66_v29 = vpop.xlane.xlu0 %65  ;;  %v72_v30 = vpop.xlane.xlu1 %71 }
  0x9c   :  { %v75_v31 = vmul.f32 0.03125, %v66_v29  ;;  %v77_v32 = vmul.f32 0.03125, %v72_v30  ;;  %v82_v33 = vmul.f32 %v78_v27, %v78_v27  ;;  %v84_v34 = vmul.f32 %v80_v28, %v80_v28 }
  0x9d   :  { %vm2840_vm4 = vcmp.eq.s32.totalorder %v311_v25, %v2806_v19 }
  0x9e   :  { %v79_v35 = vsub.f32 %v55_v2, %v75_v31  ;;  %v81_v36 = vsub.f32 %v57_v5, %v77_v32  ;;  %v86_v37 = vsel %vm4020_vm0, %v82_v33, 0.0  ;;  %v92_v38 = vsel %vm4020_vm0, %v84_v34, 0.0 }
  0x9f   :  { %87 = vadd.xlane.f32.xlu0 %v86_v37  ;;  %v297_v31 = vadd.s32 72, %v2780_v9  ;;  %v4000_v32 = vmov 0.0  }
  0xa0   :  { %v83_v39 = vmul.f32 %v79_v35, %v79_v35  ;;  %v85_v40 = vmul.f32 %v81_v36, %v81_v36  ;;  %v401_v33 = vsel %vm2812_vm1, 1.0, %v4000_v32  ;;  %v402_v34 = vsel %vm2817_vm2, 1.0, %v4000_v32 }
  0xa1   :  { %v405_v44 = vsel %vm2833_vm3, 1.0, %v4000_v32  ;;  %v406_v45 = vsel %vm2840_vm4, 1.0, %v4000_v32 }
  0xa2   :  { %v89_v41 = vsel %vm4020_vm0, %v83_v39, 0.0  ;;  %v95_v42 = vsel %vm4020_vm0, %v85_v40, 0.0  ;;  %v2845_v40 = vadd.s32 8, %v2780_v9 }
  0xa3   :  { %93 = vadd.xlane.f32.xlu0 %v92_v38  ;;  %90 = vadd.xlane.f32.xlu1 %v89_v41  ;;  %v4047_v38 = vmov 0  ;;  %v2423_v41 = vpack.i.bf16 %v402_v34, %v401_v33  ;;  %v144_v33 = vsub.s32 1, %v2780_v9 }
  0xa4   :  { %v4048_v38 = vsel %vm2840_vm4, 4294967295, %v4047_v38 }
  0xa7   :  { %96 = vadd.xlane.f32.xlu1 %v95_v42  ;;  %v313_v42 = vshra.s32 %v297_v31, 5 }
  0xa9   :  { %vm2875_vm6 = vcmp.eq.s32.totalorder %v313_v42, %v2806_v19 }
 0x12c   :  { %v88_v49 = vpop.xlane.xlu0 %87 }
 0x12d   :  { %v98_v50 = vmul.f32 0.03125, %v88_v49  ;;  %v4049_v49 = vmov 0 }
 0x12f   :  { %v102_v51 = vadd.f32 1e-05, %v98_v50  ;;  %v304_v50 = vshra.s32 %v2780_v9, 5 }
 0x130   :  { %v91_v52 = vpop.xlane.xlu1 %90  ;;  %v94_v53 = vpop.xlane.xlu0 %93 }
 0x131   :  { %v99_v54 = vmul.f32 0.03125, %v91_v52  ;;  %2537 = vrsqrt.f32 %v102_v51  ;;  %v100_v56 = vmul.f32 0.03125, %v94_v53  ;;  %v305_v51 = vshra.s32 %v2845_v40, 5 }
 0x132   :  { %v2867_v52 = vadd.s32 40, %v2780_v9  ;;  %vm2892_vm7 = vcmp.eq.s32.totalorder %v304_v50, %v2806_v19 }
 0x133   :  { %v103_v55 = vadd.f32 1e-05, %v99_v54  ;;  %v104_v59 = vadd.f32 1e-05, %v100_v56  ;;  %v2433_v56 = vpack.i.bf16 %v406_v45, %v405_v44  ;;  %vm2897_vm8 = vcmp.eq.s32.totalorder %v305_v51, %v2806_v19 }
 0x134   :  { %v97_v57 = vpop.xlane.xlu1 %96 }
 0x135   :  { %2539 = vrsqrt.f32 %v103_v55  ;;  %v101_v58 = vmul.f32 0.03125, %v97_v57  ;;  %v4051_v57 = vmov 0 }
 0x136   :  { %v4052_v57 = vsel %vm2875_vm6, 4294967295, %v4051_v57 }
 0x137   :  { %v105_v60 = vadd.f32 1e-05, %v101_v58 }
 0x139   :  { %2541 = vrsqrt.f32 %v105_v60 }
 0x13a   :  { %2543 = vrsqrt.f32 %v104_v59  ;;  %v408_v59 = vsel %vm2875_vm6, 1.0, %v4000_v32 }
 0x13b   :  { %v2538_v61 = vpop.eup %2537 }
 0x13c   :  { %v110_v63 = vmul.f32 %v2538_v61, %v78_v27  ;;  %v296_v27 = vadd.s32 64, %v2780_v9 }
 0x13e   :  { %v312_v39 = vshra.s32 %v296_v27, 5  ;;  %v4064_v27 = vmov 0 }
 0x13f   :  { %v2540_v62 = vpop.eup %2539 }
 0x140   :  { %v111_v0 = vmul.f32 %v2540_v62, %v79_v35  ;;  %vm2860_vm5 = vcmp.eq.s32.totalorder %v312_v39, %v2806_v19 }
 0x141   :  { %v4050_v49 = vsel %vm2860_vm5, 4294967295, %v4049_v49  ;;  %v407_v58 = vsel %vm2860_vm5, 1.0, %v4000_v32 }
 0x142   :  { %v114_v1 = vpack.c.bf16 %v111_v0, %v110_v63  ;;  %v308_v0 = vshra.s32 %v2857_v47, 5 }
 0x143   :  { %v2542_v2 = vpop.eup %2541 }
 0x144   :  { %2050 = vmatmul.mubr.msk.bf16.vlgmr.msra.gmra.mrb[0].mxu0 %vm4020_vm0, %v114_v1  ;;  %v2544_v3 = vpop.eup %2543  ;;  %v113_v4 = vmul.f32 %v2542_v2, %v81_v36  ;;  %v309_v1 = vshra.s32 %v2867_v52, 5  ;;  %v2438_v2 = vpack.i.bf16 %v408_v59, %v407_v58  ;;  %vm2915_vm9 = vcmp.eq.s32.totalorder %v308_v0, %v2806_v19 }
 0x145   :  { %276 = vmatprep.mubr.bf16.mxu0 %v2615_v8  ;;  %v112_v5 = vmul.f32 %v2544_v3, %v80_v28  ;;  %v2794_v8 = vld [vmem:[%s3984_s3] sm:$0x3]  ;;  %s2617_s3 = smov 96   ;;  %v298_v3 = vadd.s32 80, %v2780_v9 }
 0x146   :  { %v141_v18 = vrot.slane %v2794_v8, %v140_v12  ;;  %vm2923_vm10 = vcmp.eq.s32.totalorder %v309_v1, %v2806_v19  ;;  %v145_v34 = vrot.slane %v2794_v8, %v144_v33 }
 0x147   :  { %v115_v6 = vpack.c.bf16 %v113_v4, %v112_v5  ;;  %v299_v4 = vadd.s32 88, %v2780_v9  ;;  %v399_v5 = vsel %vm2892_vm7, 1.0, %v4000_v32  ;;  %v314_v16 = vshra.s32 %v298_v3, 5 }
 0x148   :  { %v404_v21 = vsel %vm2923_vm10, 1.0, %v4000_v32 }
 0x149   :  { %vm2937_vm11 = vcmp.eq.s32.totalorder %v314_v16, %v2806_v19 }
 0x14c   :  { %2051 = vmatmul.mubr.msk.bf16.gmra.mrb[4].mxu0 %vm4020_vm0, %v115_v6  ;;  %v400_v6 = vsel %vm2897_vm8, 1.0, %v4000_v32 }
 0x14d   :  { %v2418_v12 = vpack.i.bf16 %v400_v6, %v399_v5 }
 0x217   :  { %v268_v20 = vpop.f32.mrb[0].mxu0 }
 0x218   :  { %v2809_v22 = vpop.f32.mrb[1].mxu0  ;;  %v269_v28 = vadd.f32 %v268_v20, %v141_v18  ;;  %v403_v20 = vsel %vm2915_vm9, 1.0, %v4000_v32 }
 0x219   :  { %v272_v26 = vpop.f32.mrb[2].mxu0  ;;  %v2428_v25 = vpack.i.bf16 %v404_v21, %v403_v20  ;;  %v2993_v0 = vadd.f32 %v2809_v22, %v145_v34 }
 0x21a   :  { %v273_v29 = vadd.f32 %v272_v26, %v141_v18  ;;  %v2823_v30 = vpop.f32.mrb[3].mxu0  ;;  %v4061_v26 = vmov 0 }
 0x21b   :  { %v4062_v26 = vsel %vm2937_vm11, 4294967295, %v4061_v26  ;;  %v2996_v1 = vadd.f32 %v2823_v30, %v145_v34 }
 0x21c   :  { %v2837_v36 = vpack.i.bf16 %v273_v29, %v269_v28  ;;  %v495_v37 = vpack.c.bf16 %v273_v29, %v269_v28  ;;  %4063 = vst [vmem:[#allocation2_spill] sm:$0xff] %v4062_v26  ;;  %v409_v28 = vsel %vm2937_vm11, 1.0, %v4000_v32 }
 0x21e   :  { %2404 = vrot.lane.b32.xlu0 %v2837_v36, %s2617_s3  ;;  %2207 = vmatprep.mubr.msk.bf16.mxu1 %vm4020_vm0, %v495_v37 }
 0x21f   :  { %v278_v43 = vpop.f32.mrb[4].mxu0 }
 0x220   :  { %v280_v46 = vpop.f32.mrb[5].mxu0  ;;  %v2869_v53 = vadd.f32 %v278_v43, %v141_v18 }
 0x221   :  { %v282_v48 = vpop.f32.mrb[6].mxu0  ;;  %v2960_v42 = vadd.f32 %v280_v46, %v145_v34 }
 0x222   :  { %v2871_v54 = vadd.f32 %v282_v48, %v141_v18  ;;  %2424 = vrot.lane.b32.xlu0 %v2423_v41, %s2618_s22  ;;  %v284_v55 = vpop.f32.mrb[7].mxu0  ;;  %v315_v18 = vshra.s32 %v299_v4, 5 }
 0x223   :  { %v2962_v43 = vadd.f32 %v284_v55, %v145_v34  ;;  %v1363_v46 = vsel %vm2812_vm1, %v2960_v42, 0.0  ;;  %v1367_v22 = vsel %vm2833_vm3, %v2960_v42, 0.0 }
 0x224   :  { %v2887_v60 = vpack.i.bf16 %v2871_v54, %v2869_v53  ;;  %vm2942_vm12 = vcmp.eq.s32.totalorder %v315_v18, %v2806_v19 }
 0x225   :  { %v4065_v27 = vsel %vm2942_vm12, 4294967295, %v4064_v27  ;;  %v410_v29 = vsel %vm2942_vm12, 1.0, %v4000_v32  ;;  %v1364_v55 = vsel %vm2817_vm2, %v2962_v43, 0.0  ;;  %v1368_v30 = vsel %vm2840_vm4, %v2962_v43, 0.0 }
 0x226   :  { %2434 = vrot.lane.b32.xlu0 %v2433_v56, %s2618_s22  ;;  %2409 = vrot.lane.b32.xlu1 %v2887_v60, %s2617_s3  ;;  %4066 = vst [vmem:[#allocation3_spill] sm:$0xff] %v4065_v27  ;;  %v2443_v31 = vpack.i.bf16 %v410_v29, %v409_v28 }
 0x22a   :  { %2439 = vrot.lane.b32.xlu0 %v2438_v2, %s2618_s22  ;;  %2414 = vrot.lane.b32.xlu1 %v2837_v36, %s2619_s24 }
 0x22e   :  { %2449 = vrot.lane.b32.xlu0 %v2887_v60, %s2619_s24  ;;  %2419 = vrot.lane.b32.xlu1 %v2418_v12, %s2618_s22 }
 0x232   :  { %2429 = vrot.lane.b32.xlu1 %v2428_v25, %s2618_s22 }
 0x236   :  { %2444 = vrot.lane.b32.xlu1 %v2443_v31, %s2618_s22 }
 0x290   :  { %v2405_v37 = vpop.permute.xlu0 %2404 }
 0x291   :  { %v2956_v39 = vunpack.i.h.bf16 %v2405_v37  ;;  %v2958_v41 = vunpack.i.l.bf16 %v2405_v37 }
 0x293   :  { %v355_v44 = vsel %vm2892_vm7, %v2958_v41, 0.0  ;;  %v356_v45 = vsel %vm2897_vm8, %v2956_v39, 0.0  ;;  %v359_v18 = vsel %vm2915_vm9, %v2958_v41, 0.0  ;;  %v360_v20 = vsel %vm2923_vm10, %v2956_v39, 0.0 }
 0x294   :  { %v2970_v48 = vpop.permute.xlu0 %2424  ;;  %v497_v8 = vpack.c.bf16 %v356_v45, %v355_v44  ;;  %v363_v61 = vsel %vm2860_vm5, %v2958_v41, 0.0 }
 0x295   :  { %v4006_v50 = vunpack.i.h.bf16 %v2970_v48  ;;  %v4009_v51 = vunpack.i.l.bf16 %v2970_v48 }
 0x296   :  { %2387 = vmatprep.subr.msk.bf16.mxu1 %vm4020_vm0, %v497_v8  ;;  %v512_v56 = vsel %vm4020_vm0, %v497_v8, 0  ;;  %v1369_v8 = vsel %vm2860_vm5, %v2993_v0, 0.0 }
 0x297   :  { %v2985_v58 = vsel %vm4020_vm0, %v1364_v55, %v4006_v50  ;;  %v2990_v59 = vsel %vm4020_vm0, %v1363_v46, %v4009_v51  ;;  %2192 = vmatpush3.bf16.xpose.msra.mxu1 %v512_v56  ;;  %v1370_v46 = vsel %vm2875_vm6, %v2996_v1, 0.0  ;;  %v499_v56 = vpack.c.bf16 %v360_v20, %v359_v18 }
 0x298   :  { %v2410_v3 = vpop.permute.xlu1 %2409  ;;  %v3000_v4 = vpop.permute.xlu0 %2434  ;;  %v4159_v7 = vpack.c.bf16 %v2985_v58, %v2990_v59 }
 0x299   :  { %v3002_v5 = vunpack.i.h.bf16 %v2410_v3  ;;  %v3004_v6 = vunpack.i.l.bf16 %v2410_v3  ;;  %v4004_v12 = vunpack.i.h.bf16 %v3000_v4  ;;  %v4005_v16 = vunpack.i.l.bf16 %v3000_v4 }
 0x29b   :  { %v3023_v21 = vsel %vm4020_vm0, %v1368_v30, %v4004_v12  ;;  %v3028_v25 = vsel %vm4020_vm0, %v1367_v22, %v4005_v16  ;;  %v357_v28 = vsel %vm2812_vm1, %v3004_v6, 0.0  ;;  %v358_v29 = vsel %vm2817_vm2, %v3002_v5, 0.0 }
 0x29c   :  { %v3038_v33 = vpop.permute.xlu1 %2414  ;;  %v3040_v34 = vpop.permute.xlu0 %2439  ;;  %v498_v37 = vpack.c.bf16 %v358_v29, %v357_v28  ;;  %v1361_v29 = vsel %vm2892_vm7, %v2993_v0, 0.0  ;;  %v362_v30 = vsel %vm2840_vm4, %v3002_v5, 0.0  ;;  %v4163_v59 = vpack.c.bf16 %v3023_v21, %v3028_v25 }
 0x29d   :  { %v4002_v44 = vunpack.i.h.bf16 %v3040_v34  ;;  %v4003_v45 = vunpack.i.l.bf16 %v3040_v34 }
 0x29e   :  { %2388 = vmatprep.subr.msk.bf16.mxu1 %vm4020_vm0, %v498_v37  ;;  %v515_v55 = vsel %vm4020_vm0, %v498_v37, 0  ;;  %v1362_v37 = vsel %vm2897_vm8, %v2996_v1, 0.0 }
 0x29f   :  { %v3055_v3 = vsel %vm4020_vm0, %v1370_v46, %v4002_v44  ;;  %v3060_v22 = vsel %vm4020_vm0, %v1369_v8, %v4003_v45  ;;  %2194 = vmatpush3.bf16.xpose.msra.mxu1 %v515_v55  ;;  %v361_v55 = vsel %vm2833_vm3, %v3004_v6, 0.0  ;;  %v1366_v44 = vsel %vm2923_vm10, %v2996_v1, 0.0 }
 0x2a0   :  { %4067 = vst [vmem:[#allocation4_spill] sm:$0xff] %v3055_v3  ;;  %4068 = vst [vmem:[#allocation5_spill] sm:$0xff] %v3060_v22  ;;  %v3064_v28 = vpop.permute.xlu1 %2419  ;;  %2389 = vmatprep.subr.msk.bf16.mxu1 %vm4020_vm0, %v499_v56  ;;  %v518_v45 = vsel %vm4020_vm0, %v499_v56, 0  ;;  %v500_v12 = vpack.c.bf16 %v362_v30, %v361_v55  ;;  %v1372_v55 = vsel %vm2942_vm12, %v2962_v43, 0.0 }
 0x2a1   :  { %v4012_v18 = vunpack.i.h.bf16 %v3064_v28  ;;  %v4013_v20 = vunpack.i.l.bf16 %v3064_v28 }
 0x2a2   :  { %v521_v51 = vsel %vm4020_vm0, %v500_v12, 0 }
 0x2a3   :  { %v3078_v8 = vsel %vm4020_vm0, %v1362_v37, %v4012_v18  ;;  %v3083_v46 = vsel %vm4020_vm0, %v1361_v29, %v4013_v20  ;;  %v1365_v29 = vsel %vm2915_vm9, %v2993_v0, 0.0  ;;  %v366_v18 = vsel %vm2942_vm12, %v3002_v5, 0.0 }
 0x2a4   :  { %v3093_v2 = vpop.permute.xlu1 %2429 }
 0x2a5   :  { %v4007_v37 = vunpack.i.h.bf16 %v3093_v2  ;;  %v4008_v32 = vunpack.i.l.bf16 %v3093_v2 }
 0x2a7   :  { %v3107_v31 = vsel %vm4020_vm0, %v1366_v44, %v4007_v37  ;;  %v3112_v16 = vsel %vm4020_vm0, %v1365_v29, %v4008_v32  ;;  %2196 = vmatpush3.bf16.xpose.msra.mxu1 %v518_v45  ;;  %v1371_v44 = vsel %vm2937_vm11, %v2960_v42, 0.0  ;;  %v364_v37 = vsel %vm2875_vm6, %v2956_v39, 0.0 }
 0x2a8   :  { %v3116_v50 = vpop.permute.xlu1 %2444  ;;  %2390 = vmatprep.subr.msk.bf16.mxu1 %vm4020_vm0, %v500_v12 }
 0x2a9   :  { %v4010_v56 = vunpack.i.h.bf16 %v3116_v50  ;;  %v4011_v30 = vunpack.i.l.bf16 %v3116_v50 }
 0x2ab   :  { %v3130_v45 = vsel %vm4020_vm0, %v1372_v55, %v4010_v56  ;;  %v3135_v29 = vsel %vm4020_vm0, %v1371_v44, %v4011_v30  ;;  %v501_v55 = vpack.c.bf16 %v364_v37, %v363_v61  ;;  %v300_v44 = vadd.s32 96, %v2780_v9 }
 0x2ac   :  { %4069 = vst [vmem:[#allocation6_spill] sm:$0xff] %v3130_v45  ;;  %4070 = vst [vmem:[#allocation7_spill] sm:$0xff] %v3135_v29  ;;  %v301_v56 = vadd.s32 104, %v2780_v9  ;;  %v365_v30 = vsel %vm2937_vm11, %v3004_v6, 0.0  ;;  %v4073_v37 = vmov 0  ;;  %v302_v29 = vadd.s32 112, %v2780_v9 }
 0x2ad   :  { %v524_v32 = vsel %vm4020_vm0, %v501_v55, 0  ;;  %v502_v20 = vpack.c.bf16 %v366_v18, %v365_v30  ;;  %v316_v12 = vshra.s32 %v300_v44, 5 }
 0x2ae   :  { %v317_v61 = vshra.s32 %v301_v56, 5  ;;  %v318_v44 = vshra.s32 %v302_v29, 5  ;;  %v3194_v29 = vunpack.i.h.bf16 %v3038_v33 }
 0x2af   :  { %2198 = vmatpush3.bf16.xpose.msra.mxu1 %v521_v51  ;;  %vm3158_vm13 = vcmp.eq.s32.totalorder %v316_v12, %v2806_v19  ;;  %v4071_v51 = vmov 0  ;;  %v527_v56 = vsel %vm4020_vm0, %v502_v20, 0 }
 0x2b0   :  { %2391 = vmatprep.subr.msk.bf16.mxu1 %vm4020_vm0, %v501_v55  ;;  %v4072_v51 = vsel %vm3158_vm13, 4294967295, %v4071_v51  ;;  %vm3163_vm14 = vcmp.eq.s32.totalorder %v317_v61, %v2806_v19  ;;  %v303_v55 = vadd.s32 120, %v2780_v9  ;;  %vm3178_vm15 = vcmp.eq.s32.totalorder %v318_v44, %v2806_v19 }
 0x2b1   :  { %v4074_v37 = vsel %vm3163_vm14, 4294967295, %v4073_v37  ;;  %v368_v18 = vsel %vm3163_vm14, %v2956_v39, 0.0  ;;  %v4075_v61 = vmov 0  ;;  %v369_v39 = vsel %vm3178_vm15, %v3004_v6, 0.0 }
 0x2b2   :  { %v319_v12 = vshra.s32 %v303_v55, 5  ;;  %v4076_v61 = vsel %vm3178_vm15, 4294967295, %v4075_v61  ;;  %v3197_v55 = vunpack.i.l.bf16 %v3038_v33  ;;  %v4079_v44 = vunpack.i.l.bf16 %v3064_v28 }
 0x2b3   :  { %v4170_v25 = vld [vmem:[#allocation6_spill] sm:$0xff] }
 0x2b4   :  { %vm3183_vm12 = vcmp.eq.s32.totalorder %v319_v12, %v2806_v19  ;;  %v383_v6 = vsel %vm2892_vm7, %v3197_v55, 0.0  ;;  %v4080_v12 = vunpack.i.h.bf16 %v3064_v28  ;;  %v4081_v28 = vunpack.i.l.bf16 %v2970_v48 }
 0x2b5   :  { %v479_v33 = vsel %vm4020_vm0, %v383_v6, %v4079_v44 }
 0x2b7   :  { %2200 = vmatpush3.bf16.xpose.msra.mxu1 %v524_v32  ;;  %v367_v32 = vsel %vm3158_vm13, %v2958_v41, 0.0  ;;  %v4077_v41 = vmov 0 }
 0x2b8   :  { %2392 = vmatprep.subr.msk.bf16.mxu1 %vm4020_vm0, %v502_v20  ;;  %v503_v30 = vpack.c.bf16 %v368_v18, %v367_v32  ;;  %v4078_v41 = vsel %vm3183_vm12, 4294967295, %v4077_v41  ;;  %v370_v20 = vsel %vm3183_vm12, %v3002_v5, 0.0  ;;  %v384_v5 = vsel %vm2897_vm8, %v3194_v29, 0.0 }
 0x2b9   :  { %v504_v18 = vpack.c.bf16 %v370_v20, %v369_v39 }
 0x2ba   :  { %v530_v32 = vsel %vm4020_vm0, %v503_v30, 0 }
 0x2bf   :  { %2202 = vmatpush3.bf16.xpose.msra.mxu1 %v527_v56  ;;  %v2450_v56 = vpop.permute.xlu0 %2449 }
 0x2c0   :  { %2393 = vmatprep.subr.msk.bf16.mxu1 %vm4020_vm0, %v503_v30  ;;  %v480_v30 = vsel %vm4020_vm0, %v384_v5, %v4080_v12  ;;  %v3213_v39 = vunpack.i.h.bf16 %v2450_v56  ;;  %v3215_v20 = vunpack.i.l.bf16 %v2450_v56  ;;  %v4082_v56 = vunpack.i.h.bf16 %v2970_v48 }
 0x2c1   :  { %v624_v45 = vpack.c.bf16 %v480_v30, %v479_v33  ;;  %v387_v12 = vsel %vm2915_vm9, %v3197_v55, 0.0  ;;  %v388_v30 = vsel %vm2923_vm10, %v3194_v29, 0.0 }
 0x2c2   :  { %v385_v22 = vsel %vm2812_vm1, %v3215_v20, 0.0  ;;  %v386_v6 = vsel %vm2817_vm2, %v3213_v39, 0.0 }
 0x2c3   :  { %v481_v5 = vsel %vm4020_vm0, %v385_v22, %v4081_v28  ;;  %v482_v44 = vsel %vm4020_vm0, %v386_v6, %v4082_v56  ;;  %v4084_v22 = vunpack.i.l.bf16 %v3093_v2  ;;  %v390_v6 = vsel %vm2840_vm4, %v3213_v39, 0.0 }
 0x2c4   :  { %v625_v33 = vpack.c.bf16 %v482_v44, %v481_v5  ;;  %v4087_v56 = vunpack.i.h.bf16 %v3000_v4  ;;  %v391_v44 = vsel %vm2860_vm5, %v3197_v55, 0.0  ;;  %vm4090_vm5 = vnez %v4065_v27 }
 0x2c5   :  { %v483_v48 = vsel %vm4020_vm0, %v387_v12, %v4084_v22  ;;  %v4089_v22 = vunpack.i.h.bf16 %v3040_v34 }
 0x2c7   :  { %2204 = vmatpush3.bf16.xpose.msra.mxu1 %v530_v32  ;;  %v533_v32 = vsel %vm4020_vm0, %v504_v18, 0 }
 0x2c8   :  { %2394 = vmatprep.subr.msk.bf16.mxu1 %vm4020_vm0, %v504_v18  ;;  %v4083_v18 = vpack.c.bf16 %v2871_v54, %v2869_v53  ;;  %v389_v54 = vsel %vm2833_vm3, %v3215_v20, 0.0 }
 0x2cf   :  { %2206 = vmatpush3.bf16.xpose.msra.mxu1 %v533_v32  ;;  %v4085_v32 = vunpack.i.h.bf16 %v3093_v2  ;;  %v486_v2 = vsel %vm4020_vm0, %v390_v6, %v4087_v56  ;;  %v4023_v56 = vshra.s32 %v2783_v10, 4 }
 0x2d0   :  { %2211 = vmatprep.subr.bf16.mxu1 %v624_v45 }
 0x2d1   :  { %v484_v53 = vsel %vm4020_vm0, %v388_v30, %v4085_v32  ;;  %v393_v32 = vsel %vm2937_vm11, %v3215_v20, 0.0 }
 0x2d2   :  { %v626_v28 = vpack.c.bf16 %v484_v53, %v483_v48  ;;  %v394_v53 = vsel %vm4090_vm5, %v3213_v39, 0.0 }
 0x2d6   :  { %2208 = vmatmul.mubr.msk.bf16.vlgmr.msra.gmra.mrb[0].mxu1 %vm4020_vm0, %v4083_v18  ;;  %v392_v18 = vsel %vm2875_vm6, %v3194_v29, 0.0 }
 0x2d7   :  { %2212 = vmatpush3.bf16.msra.mxu1 %v624_v45  ;;  %v4086_v45 = vunpack.i.l.bf16 %v3000_v4  ;;  %v488_v4 = vsel %vm4020_vm0, %v392_v18, %v4089_v22 }
 0x2d8   :  { %2213 = vmatprep.subr.bf16.mxu1 %v625_v33 }
 0x2d9   :  { %v485_v5 = vsel %vm4020_vm0, %v389_v54, %v4086_v45  ;;  %v4091_v54 = vunpack.i.l.bf16 %v3116_v50 }
 0x2da   :  { %v627_v12 = vpack.c.bf16 %v486_v2, %v485_v5  ;;  %v592_v5 = vand.u32 31, %v2789_v13 }
 0x2db   :  { %2214 = vmatpush3.bf16.msra.mxu1 %v625_v33  ;;  %v4088_v33 = vunpack.i.l.bf16 %v3040_v34  ;;  %v489_v6 = vsel %vm4020_vm0, %v393_v32, %v4091_v54 }
 0x2dc   :  { %2215 = vmatprep.subr.bf16.mxu1 %v626_v28  ;;  %v3284_v2 = vshra.s32 %v592_v5, 4 }
 0x2dd   :  { %v487_v30 = vsel %vm4020_vm0, %v391_v44, %v4088_v33  ;;  %v4025_v44 = vshra.s32 %v2845_v40, 4 }
 0x2de   :  { %v628_v48 = vpack.c.bf16 %v488_v4, %v487_v30  ;;  %4093 = vst [vmem:[#allocation8_spill] sm:$0xff] %v3284_v2  ;;  %vm596_vm5 = vcmp.eq.s32.totalorder %v4023_v56, %v3284_v2 }
 0x2df   :  { %2216 = vmatpush3.bf16.msra.mxu1 %v626_v28  ;;  %v4092_v28 = vunpack.i.h.bf16 %v3116_v50  ;;  %v4024_v50 = vshra.s32 %v2780_v9, 4 }
 0x2e0   :  { %2217 = vmatprep.subr.bf16.mxu1 %v627_v12 }
 0x2e1   :  { %v490_v34 = vsel %vm4020_vm0, %v394_v53, %v4092_v28  ;;  %vm595_vm0 = vcmp.eq.s32.totalorder %v4025_v44, %v3284_v2  ;;  %vm594_vm11 = vcmp.eq.s32.totalorder %v4024_v50, %v3284_v2  ;;  %v4022_v53 = vshra.s32 %v2786_v11, 4 }
 0x2e2   :  { %v629_v45 = vpack.c.bf16 %v490_v34, %v489_v6  ;;  %v1373_v44 = vsel %vm3158_vm13, %v2993_v0, 0.0  ;;  %v396_v0 = vsel %vm3163_vm14, %v3194_v29, 0.0 }
 0x2e3   :  { %2218 = vmatpush3.bf16.msra.mxu1 %v627_v12 }
 0x2e4   :  { %2219 = vmatprep.subr.bf16.mxu1 %v628_v48 }
 0x2e7   :  { %2220 = vmatpush3.bf16.msra.mxu1 %v628_v48 }
 0x2e8   :  { %2221 = vmatprep.subr.bf16.mxu1 %v629_v45 }
 0x2eb   :  { %2222 = vmatpush3.bf16.msra.mxu1 %v629_v45  ;;  %v4094_v45 = vmov 0.0  }
 0x2ec   :  { %v411_v5 = vsel %vm3158_vm13, 1.0, %v4094_v45 }
 0x3a9   :  { %v2209_v18 = vpop.f32.mrb[0].mxu1 }
 0x3aa   :  { %v586_v12 = vmul.f32 0.35355338, %v2209_v18  ;;  %v569_v33 = vpop.f32.mrb[1].mxu1  ;;  %v412_v18 = vsel %vm3163_vm14, 1.0, %v4094_v45 }
 0x3ab   :  { %v2210_v30 = vpop.f32.mrb[2].mxu1  ;;  %v584_v22 = vmul.f32 0.35355338, %v569_v33  ;;  %v414_v33 = vsel %vm3183_vm12, 1.0, %v4094_v45 }
 0x3ac   :  { %v572_v4 = vpop.f32.mrb[3].mxu1  ;;  %v600_v48 = vsel %vm596_vm5, %v586_v12, -1e+30  ;;  %v587_v6 = vmul.f32 0.35355338, %v2210_v30  ;;  %vm597_vm5 = vcmp.eq.s32.totalorder %v4022_v53, %v3284_v2  ;;  %v413_v12 = vsel %vm3178_vm15, 1.0, %v4094_v45 }
 0x3ad   :  { %v585_v32 = vmul.f32 0.35355338, %v572_v4  ;;  %606 = vmax.xlane.f32.xlu1 %v600_v48  ;;  %v598_v28 = vsel %vm594_vm11, %v584_v22, -1e+30  ;;  %v2453_v30 = vpack.i.bf16 %v412_v18, %v411_v5  ;;  %v2458_v22 = vpack.i.bf16 %v414_v33, %v413_v12  ;;  %v3318_v4 = vld [vmem:[%s3985_s1] sm:$0xff] }
 0x3ae   :  { %v601_v34 = vsel %vm597_vm5, %v587_v6, -1e+30  ;;  %v3325_v6 = vld [vmem:[%s3985_s1 + $0x8] sm:$0xff] }
 0x3af   :  { %v599_v54 = vsel %vm595_vm0, %v585_v32, -1e+30  ;;  %vm4095_vm0 = vcmask 261120  }
 0x3b0   :  { %604 = vmax.xlane.f32.xlu0 %v599_v54  ;;  %v791_v32 = vsel %vm4095_vm0, %v3318_v4, 0.0  ;;  %vm4096_vm11 = vmmov %vm4095_vm0 }
 0x3b1   :  { %602 = vmax.xlane.f32.xlu1 %v598_v28  ;;  %v794_v5 = vsel %vm4096_vm11, %v3325_v6, 0.0  ;;  %vm4097_vm5 = vmmov %vm4095_vm0 }
 0x3b2   :  { %vm4098_vm11 = vmmov %vm4095_vm0 }
 0x3b3   :  { %vm4099_vm6 = vmmov %vm4095_vm0 }
 0x3b5   :  { %608 = vmax.xlane.f32.xlu1 %v601_v34 }
 0x3c6   :  { %2454 = vrot.lane.b32.xlu0 %v2453_v30, %s2618_s22  ;;  %2459 = vrot.lane.b32.xlu1 %v2458_v22, %s2618_s22 }
 0x3e5   :  { %792 = vadd.xlane.f32.xlu0 %v791_v32  ;;  %v1374_v32 = vsel %vm3163_vm14, %v2996_v1, 0.0  ;;  %vm4131_vm14 = vcmask 261120  }
 0x3ea   :  { %795 = vadd.xlane.f32.xlu1 %v794_v5 }
 0x43a   :  { %v607_v18 = vpop.xlane.xlu1 %606 }
 0x43b   :  { %v612_v33 = vsub.f32 %v600_v48, %v607_v18  ;;  %v397_v18 = vsel %vm3178_vm15, %v3215_v20, 0.0 }
 0x43d   :  { %v605_v12 = vpop.xlane.xlu0 %604  ;;  %v618_v27 = vmul.f32 1.442695, %v612_v33 }
 0x43e   :  { %v611_v30 = vsub.f32 %v599_v54, %v605_v12  ;;  %v603_v22 = vpop.xlane.xlu1 %602 }
 0x43f   :  { %v610_v53 = vsub.f32 %v598_v28, %v603_v22 }
 0x440   :  { %v616_v56 = vmul.f32 1.442695, %v611_v30 }
 0x441   :  { %v614_v50 = vmul.f32 1.442695, %v610_v53  ;;  %v2455_v2 = vpop.permute.xlu0 %2454  ;;  %v395_v53 = vsel %vm3158_vm13, %v3197_v55, 0.0  ;;  %vm4132_vm13 = vmmov %vm4131_vm14 }
 0x442   :  { %2545 = vpow2.f32 %v616_v56  ;;  %v2457_v5 = vunpack.i.h.bf16 %v2455_v2  ;;  %v2456_v26 = vunpack.i.l.bf16 %v2455_v2  ;;  %v609_v3 = vpop.xlane.xlu1 %608  ;;  %vm4133_vm4 = vmmov %vm4132_vm13 }
 0x443   :  { %2547 = vpow2.f32 %v614_v50  ;;  %v613_v48 = vsub.f32 %v601_v34, %v609_v3 }
 0x444   :  { %v3342_v54 = vsel %vm4097_vm5, %v1374_v32, %v2457_v5  ;;  %v3345_v1 = vsel %vm4095_vm0, %v1373_v44, %v2456_v26  ;;  %v491_v56 = vsel %vm4098_vm11, %v395_v53, %v2456_v26  ;;  %v492_v2 = vsel %vm4099_vm6, %v396_v0, %v2457_v5  ;;  %vm4100_vm6 = vmmov %vm4095_vm0  ;;  %v2513_v0 = vld [vmem:[%s3986_s8] sm:$0xff]  }
 0x445   :  { %v620_v50 = vmul.f32 1.442695, %v613_v48  ;;  %v630_v28 = vpack.c.bf16 %v492_v2, %v491_v56  ;;  %2549 = vpow2.f32 %v618_v27  ;;  %v1375_v44 = vsel %vm3178_vm15, %v2960_v42, 0.0  ;;  %vm4101_vm5 = vmmov %vm4095_vm0 }
 0x446   :  { %v2460_v55 = vpop.permute.xlu1 %2459  ;;  %v1376_v26 = vsel %vm3183_vm12, %v2962_v43, 0.0  ;;  %v398_v27 = vsel %vm3183_vm12, %v3213_v39, 0.0  ;;  %vm4102_vm11 = vmmov %vm4095_vm0 }
 0x447   :  { %2551 = vpow2.f32 %v620_v50  ;;  %v2462_v34 = vunpack.i.h.bf16 %v2460_v55  ;;  %v2461_v29 = vunpack.i.l.bf16 %v2460_v55  ;;  %2223 = vmatprep.subr.bf16.mxu1 %v630_v28  ;;  %v2514_v55 = vld [vmem:[%s3986_s8 + $0x8] sm:$0xff]  }
 0x448   :  { %2224 = vmatpush3.bf16.msra.mxu1 %v630_v28 }
 0x449   :  { %v3364_v12 = vsel %vm4100_vm6, %v1376_v26, %v2462_v34  ;;  %v3367_v33 = vsel %vm4101_vm5, %v1375_v44, %v2461_v29  ;;  %v493_v42 = vsel %vm4095_vm0, %v397_v18, %v2461_v29  ;;  %v494_v30 = vsel %vm4102_vm11, %v398_v27, %v2462_v34  ;;  %vm4103_vm6 = vmmov %vm4095_vm0 }
 0x44a   :  { %v631_v22 = vpack.c.bf16 %v494_v30, %v493_v42  ;;  %2395 = vmatprep.subr.msk.bf16.mxu0 %vm4103_vm6, %v2513_v0  ;;  %vm4104_vm5 = vmmov %vm4095_vm0 }
 0x44b   :  { %v733_v56 = vsel %vm4104_vm5, %v2513_v0, 0  ;;  %vm4105_vm11 = vmmov %vm4095_vm0 }
 0x44c   :  { %v2546_v32 = vpop.eup %2545  ;;  %2225 = vmatprep.subr.bf16.mxu1 %v631_v22  ;;  %2232 = vmatpush3.bf16.xpose.msra.mxu0 %v733_v56  ;;  %v736_v29 = vsel %vm4105_vm11, %v2514_v55, 0  ;;  %vm4106_vm6 = vmmov %vm4095_vm0 }
 0x44d   :  { %v2548_v20 = vpop.eup %2547  ;;  %2226 = vmatpush3.bf16.msra.mxu1 %v631_v22  ;;  %2396 = vmatprep.subr.msk.bf16.mxu0 %vm4095_vm0, %v2514_v55  ;;  %vm4107_vm5 = vmmov %vm4095_vm0  ;;  %vm4033_vm0 = vmmov 0  }
 0x44e   :  { %v622_v5 = vpack.c.bf16 %v2546_v32, %v2548_v20  ;;  %2255 = vmatprep.subr.bf16.mxu1 %v4094_v45  ;;  %vm4108_vm11 = vmmov %vm4107_vm5 }
 0x44f   :  { %v2550_v39 = vpop.eup %2549  ;;  %vm4110_vm12 = vmmov %vm4107_vm5 }
 0x450   :  { %2227 = vmatprep.mubr.bf16.mxu1 %v622_v5 }
 0x451   :  { %v2552_v48 = vpop.eup %2551 }
 0x452   :  { %v623_v53 = vpack.c.bf16 %v2552_v48, %v2550_v39 }
 0x454   :  { %2228 = vmatmul.mubr.bf16.vlgmr.msra.gmra.mrb[4].mxu1 %v623_v53  ;;  %2234 = vmatpush3.bf16.xpose.msra.mxu0 %v736_v29 }
 0x455   :  { %2239 = vmatprep.subr.bf16.mxu0 %v4094_v45  ;;  %2263 = vmatprep.mubr.msk.bf16.mxu1 %vm4033_vm0, %v4094_v45 }
 0x472   :  { %v793_v42 = vpop.xlane.xlu0 %792 }
 0x473   :  { %v797_v30 = vmul.f32 0.03125, %v793_v42 }
 0x475   :  { %v799_v22 = vsub.f32 %v3318_v4, %v797_v30 }
 0x477   :  { %v796_v32 = vpop.xlane.xlu1 %795  ;;  %v801_v5 = vmul.f32 %v799_v22, %v799_v22 }
 0x478   :  { %v798_v20 = vmul.f32 0.03125, %v796_v32 }
 0x479   :  { %v803_v48 = vsel %vm4106_vm6, %v801_v5, 0.0  ;;  %vm4109_vm6 = vmmov %vm4107_vm5 }
 0x47a   :  { %v800_v39 = vsub.f32 %v3325_v6, %v798_v20  ;;  %v2515_v6 = vld [vmem:[%s3987_s4] sm:$0xff]   ;;  %v2518_v20 = vld [vmem:[%s3987_s4 + $0x18] sm:$0xff]  }
 0x47b   :  { %v871_v32 = vsel %vm4109_vm6, %v2515_v6, 0  ;;  %vm4112_vm6 = vmmov %vm4107_vm5 }
 0x47c   :  { %v802_v53 = vmul.f32 %v800_v39, %v800_v39  ;;  %v880_v5 = vsel %vm4112_vm6, %v2518_v20, 0  ;;  %v2059_v20 = vld [vmem:[%s3988_s5] ss:$0 sm:$0xff] }
 0x47e   :  { %v806_v0 = vsel %vm4107_vm5, %v802_v53, 0.0 }
 0x527   :  { %v2229_v2 = vpop.f32.mrb[4].mxu1 }
 0x528   :  { %2553 = vrcp.f32 %v2229_v2  ;;  %v666_v50 = vpop.f32.mrb[5].mxu1 }
 0x529   :  { %v2230_v28 = vpop.f32.mrb[6].mxu1 }
 0x52a   :  { %v669_v34 = vpop.f32.mrb[7].mxu1 }
 0x52b   :  { %2555 = vrcp.f32 %v669_v34 }
 0x52c   :  { %2557 = vrcp.f32 %v666_v50 }
 0x52d   :  { %2559 = vrcp.f32 %v2230_v28 }
 0x532   :  { %v2554_v44 = vpop.eup %2553 }
 0x533   :  { %693 = vrot.lane.b32.xlu0 %v2554_v44, %s2617_s3 }
 0x535   :  { %v2556_v26 = vpop.eup %2555 }
 0x536   :  { %v2558_v18 = vpop.eup %2557  ;;  %691 = vrot.lane.b32.xlu1 %v2556_v26, %s2617_s3 }
 0x537   :  { %689 = vrot.lane.b32.xlu0 %v2558_v18, %s2617_s3  ;;  %v2560_v27 = vpop.eup %2559 }
 0x53a   :  { %695 = vrot.lane.b32.xlu1 %v2560_v27, %s2617_s3 }
 0x556   :  { %804 = vadd.xlane.f32.xlu0 %v803_v48  ;;  %v2519_v48 = vld [vmem:[%s3987_s4 + $0x20] sm:$0xff]  }
 0x55e   :  { %807 = vadd.xlane.f32.xlu1 %v806_v0  ;;  %v2520_v0 = vld [vmem:[%s3987_s4 + $0x28] sm:$0xff]  }
 0x5a5   :  { %v694_v56 = vpop.permute.xlu0 %693 }
 0x5a6   :  { %v703_v27 = vmul.f32 %v2229_v2, %v694_v56  ;;  %v886_v56 = vsel %vm4107_vm5, %v2520_v0, 0 }
 0x5a8   :  { %v692_v55 = vpop.permute.xlu1 %691 }
 0x5a9   :  { %v702_v29 = vmul.f32 %v692_v55, %v669_v34  ;;  %v690_v4 = vpop.permute.xlu0 %689 }
 0x5aa   :  { %v701_v44 = vmul.f32 %v690_v4, %v666_v50  ;;  %v2516_v50 = vld [vmem:[%s3987_s4 + $0x8] sm:$0xff]  }
 0x5ab   :  { %v874_v2 = vsel %vm4110_vm12, %v2516_v50, 0  ;;  %vm4113_vm12 = vmmov %vm4107_vm5 }
 0x5ac   :  { %v705_v26 = vpack.c.bf16 %v702_v29, %v701_v44  ;;  %v696_v18 = vpop.permute.xlu1 %695  ;;  %v883_v53 = vsel %vm4113_vm12, %v2519_v48, 0  ;;  %v4118_v48 = vshra.s32 %v2780_v9, 4 }
 0x5ad   :  { %v704_v42 = vmul.f32 %v2230_v28, %v696_v18  ;;  %v2517_v28 = vld [vmem:[%s3987_s4 + $0x10] sm:$0xff]  }
 0x5ae   :  { %2235 = vmatprep.mubr.msk.bf16.mxu0 %vm4108_vm11, %v705_v26  ;;  %vm4111_vm11 = vmmov %vm4107_vm5  ;;  %vm3453_vm12 = vcmp.eq.s32.totalorder %v4118_v48, %v2806_v19 }
 0x5af   :  { %v706_v30 = vpack.c.bf16 %v704_v42, %v703_v27  ;;  %v877_v34 = vsel %vm4111_vm11, %v2517_v28, 0  ;;  %vm4114_vm11 = vmmov %vm4107_vm5 }
 0x5b1   :  { %2236 = vmatmul.mubr.msk.bf16.vlgmr.msra.gmra.mrb[8].mxu0 %vm4107_vm5, %v706_v30 }
 0x5b2   :  { %2240 = vmatpush3.bf16.xpose.msra.mxu0 %v871_v32  ;;  %2251 = vmatprep.mubr.msk.bf16.mxu0 %vm4033_vm0, %v4094_v45 }
 0x5b3   :  { %2241 = vmatprep.subr.bf16.mxu0 %v4094_v45 }
 0x5ba   :  { %2242 = vmatpush3.bf16.xpose.msra.mxu0 %v874_v2 }
 0x5bb   :  { %2243 = vmatprep.subr.bf16.mxu0 %v4094_v45 }
 0x5c2   :  { %2244 = vmatpush3.bf16.xpose.msra.mxu0 %v877_v34 }
 0x5c3   :  { %2245 = vmatprep.subr.bf16.mxu0 %v4094_v45 }
 0x5ca   :  { %2246 = vmatpush3.bf16.xpose.msra.mxu0 %v880_v5 }
 0x5cb   :  { %2247 = vmatprep.subr.bf16.mxu0 %v4094_v45 }
 0x5d2   :  { %2248 = vmatpush3.bf16.xpose.msra.mxu0 %v883_v53 }
 0x5d3   :  { %2249 = vmatprep.subr.bf16.mxu0 %v4094_v45 }
 0x5da   :  { %2250 = vmatpush3.bf16.xpose.msra.mxu0 %v886_v56 }
 0x5db   :  { %2267 = vmatprep.subr.bf16.mxu0 %v4094_v45 }
 0x5e3   :  { %v805_v55 = vpop.xlane.xlu0 %804 }
 0x5e4   :  { %v809_v29 = vmul.f32 0.03125, %v805_v55  ;;  %v4121_v55 = vshra.s32 %v2783_v10, 4  ;;  %v971_v10 = vsel %vm3453_vm12, 1.0, %v4094_v45 }
 0x5e6   :  { %v811_v4 = vadd.f32 1e-05, %v809_v29  ;;  %vm3460_vm5 = vcmp.eq.s32.totalorder %v4121_v55, %v2806_v19 }
 0x5e8   :  { %2561 = vrsqrt.f32 %v811_v4 }
 0x5eb   :  { %v808_v44 = vpop.xlane.xlu1 %807 }
 0x5ec   :  { %v810_v6 = vmul.f32 0.03125, %v808_v44 }
 0x5ee   :  { %v812_v26 = vadd.f32 1e-05, %v810_v6 }
 0x5f0   :  { %2563 = vrsqrt.f32 %v812_v26  ;;  %v4124_v26 = vshra.s32 %v2786_v11, 4 }
 0x5f2   :  { %v2562_v18 = vpop.eup %2561 }
 0x5f3   :  { %v815_v42 = vmul.f32 %v2562_v18, %v799_v22 }
 0x5fa   :  { %v2564_v27 = vpop.eup %2563 }
 0x5fb   :  { %v816_v30 = vmul.f32 %v2564_v27, %v800_v39  ;;  %v4115_v39 = vshra.s32 %v2845_v40, 4 }
 0x5fd   :  { %v817_v32 = vpack.c.bf16 %v816_v30, %v815_v42  ;;  %vm3446_vm6 = vcmp.eq.s32.totalorder %v4115_v39, %v2806_v19  ;;  %v929_v42 = vshra.s32 %v2857_v47, 4 }
 0x5fe   :  { %v972_v27 = vsel %vm3446_vm6, 1.0, %v4094_v45 }
 0x5ff   :  { %2252 = vmatmul.mubr.msk.bf16.vlgmr.msra.gmra.mrb[12].mxu0 %vm4114_vm11, %v817_v32  ;;  %vm3471_vm11 = vcmp.eq.s32.totalorder %v4124_v26, %v2806_v19  ;;  %v930_v32 = vshra.s32 %v2867_v52, 4 }
 0x600   :  { %2275 = vmatprep.mubr.msk.bf16.mxu0 %vm4033_vm0, %v4094_v45  ;;  %v974_v47 = vsel %vm3471_vm11, 1.0, %v4094_v45  ;;  %vm3496_vm0 = vcmp.eq.s32.totalorder %v929_v42, %v2806_v19 }
 0x601   :  { %vm3501_vm15 = vcmp.eq.s32.totalorder %v930_v32, %v2806_v19 }
 0x684   :  { %v3432_v50 = vpop.f32.mrb[8].mxu0 }
 0x685   :  { %v3434_v2 = vpop.f32.mrb[9].mxu0 }
 0x686   :  { %v3436_v28 = vpop.f32.mrb[10].mxu0 }
 0x687   :  { %v3438_v34 = vpop.f32.mrb[11].mxu0 }
 0x6d2   :  { %v922_v22 = vpop.f32.mrb[12].mxu0 }
 0x6d3   :  { %v2253_v0 = vpop.f32.mrb[13].mxu0  ;;  %v3464_v4 = vadd.f32 %v2059_v20, %v922_v22  ;;  %v973_v22 = vsel %vm3460_vm5, 1.0, %v4094_v45 }
 0x6d4   :  { %v925_v56 = vpop.f32.mrb[14].mxu0  ;;  %v2473_v48 = vpack.i.bf16 %v974_v47, %v973_v22  ;;  %v975_v0 = vsel %vm3496_vm0, 1.0, %v4094_v45 }
 0x6d5   :  { %v3466_v44 = vadd.f32 %v2059_v20, %v925_v56  ;;  %v2254_v6 = vpop.f32.mrb[15].mxu0  ;;  %v2468_v20 = vpack.i.bf16 %v972_v27, %v971_v10  ;;  %v976_v56 = vsel %vm3501_vm15, 1.0, %v4094_v45 }
 0x6d6   :  { %v2478_v55 = vpack.i.bf16 %v976_v56, %v975_v0 }
 0x6d7   :  { %v1019_v30 = vpack.c.bf16 %v3466_v44, %v3464_v4  ;;  %v2483_v11 = vpack.i.bf16 %v3466_v44, %v3464_v4 }
 0x6d9   :  { %2484 = vrot.lane.b32.xlu1 %v2483_v11, %s2619_s24  ;;  %2464 = vrot.lane.b32.xlu0 %v2483_v11, %s2617_s3 }
 0x6dd   :  { %2469 = vrot.lane.b32.xlu0 %v2468_v20, %s2618_s22 }
 0x6e1   :  { %2474 = vrot.lane.b32.xlu0 %v2473_v48, %s2618_s22 }
 0x6e5   :  { %2479 = vrot.lane.b32.xlu0 %v2478_v55, %s2618_s22 }
 0x74b   :  { %v2485_v6 = vpop.permute.xlu1 %2484  ;;  %v2465_v26 = vpop.permute.xlu0 %2464 }
 0x74c   :  { %v2467_v10 = vunpack.i.h.bf16 %v2465_v26  ;;  %v2466_v27 = vunpack.i.l.bf16 %v2465_v26  ;;  %v3514_v42 = vunpack.i.h.bf16 %v2485_v6  ;;  %v3516_v11 = vunpack.i.l.bf16 %v2485_v6 }
 0x74e   :  { %v949_v32 = vsel %vm3453_vm12, %v2466_v27, 0.0  ;;  %v950_v20 = vsel %vm3446_vm6, %v2467_v10, 0.0  ;;  %v963_v56 = vsel %vm3453_vm12, %v3516_v11, 0.0  ;;  %v964_v55 = vsel %vm3446_vm6, %v3514_v42, 0.0  ;;  %vm4136_vm6 = vmmov %vm4133_vm4 }
 0x74f   :  { %v2470_v22 = vpop.permute.xlu0 %2469  ;;  %v1020_v47 = vpack.c.bf16 %v950_v20, %v949_v32  ;;  %v951_v32 = vsel %vm3460_vm5, %v2466_v27, 0.0  ;;  %v952_v20 = vsel %vm3471_vm11, %v2467_v10, 0.0  ;;  %v967_v29 = vsel %vm3496_vm0, %v3516_v11, 0.0  ;;  %vm4137_vm12 = vmmov %vm4133_vm4 }
 0x750   :  { %v2472_v48 = vunpack.i.h.bf16 %v2470_v22  ;;  %v2471_v0 = vunpack.i.l.bf16 %v2470_v22  ;;  %v968_v18 = vsel %vm3501_vm15, %v3514_v42, 0.0 }
 0x751   :  { %v1028_v6 = vsel %vm4131_vm14, %v1020_v47, 0  ;;  %v965_v47 = vsel %vm3460_vm5, %v3516_v11, 0.0  ;;  %vm4135_vm14 = vmmov %vm4133_vm4 }
 0x752   :  { %v1012_v26 = vsel %vm4132_vm13, %v964_v55, %v2472_v48  ;;  %v1011_v43 = vsel %vm4133_vm4, %v963_v56, %v2471_v0  ;;  %2256 = vmatpush3.bf16.xpose.msra.mxu1 %v1028_v6  ;;  %v966_v48 = vsel %vm3471_vm11, %v3514_v42, 0.0  ;;  %v1021_v0 = vpack.c.bf16 %v952_v20, %v951_v32  ;;  %vm4134_vm13 = vmmov %vm4133_vm4 }
 0x753   :  { %v1104_v22 = vpack.c.bf16 %v1012_v26, %v1011_v43  ;;  %v2475_v53 = vpop.permute.xlu0 %2474  ;;  %2257 = vmatprep.subr.bf16.mxu1 %v4094_v45  ;;  %vm4143_vm11 = vmmov %vm4133_vm4 }
 0x754   :  { %v2477_v3 = vunpack.i.h.bf16 %v2475_v53  ;;  %v2476_v5 = vunpack.i.l.bf16 %v2475_v53  ;;  %v1031_v32 = vsel %vm4135_vm14, %v1021_v0, 0  ;;  %v932_v0 = vshra.s32 %v2802_v17, 4 }
 0x755   :  { %2268 = vmatpush3.bf16.msra.mxu0 %v1104_v22  ;;  %v953_v22 = vsel %vm3496_vm0, %v2466_v27, 0.0 }
 0x756   :  { %v1014_v56 = vsel %vm4133_vm4, %v966_v48, %v2477_v3  ;;  %v1013_v55 = vsel %vm4134_vm13, %v965_v47, %v2476_v5  ;;  %2269 = vmatprep.subr.bf16.mxu0 %v4094_v45  ;;  %v954_v5 = vsel %vm3501_vm15, %v2467_v10, 0.0  ;;  %v931_v48 = vshra.s32 %v2797_v14, 4  ;;  %vm4142_vm15 = vmmov %vm4133_vm4 }
 0x757   :  { %v1105_v43 = vpack.c.bf16 %v1014_v56, %v1013_v55  ;;  %v2480_v6 = vpop.permute.xlu0 %2479  ;;  %v1022_v56 = vpack.c.bf16 %v954_v5, %v953_v22  ;;  %vm3569_vm0 = vcmp.eq.s32.totalorder %v932_v0, %v2806_v19  ;;  %vm4144_vm13 = vmmov 0   ;;  %v2522_v55 = vld [vmem:[%s3986_s8 + $0x18] sm:$0xff]  }
 0x758   :  { %v2482_v26 = vunpack.i.h.bf16 %v2480_v6  ;;  %v2481_v53 = vunpack.i.l.bf16 %v2480_v6  ;;  %vm3564_vm5 = vcmp.eq.s32.totalorder %v931_v48, %v2806_v19  ;;  %v956_v17 = vsel %vm3569_vm0, %v2467_v10, 0.0 }
 0x759   :  { %2270 = vmatpush3.bf16.msra.mxu0 %v1105_v43  ;;  %v1034_v52 = vsel %vm4142_vm15, %v1022_v56, 0  ;;  %v955_v14 = vsel %vm3564_vm5, %v2466_v27, 0.0  ;;  %v1084_v19 = vand.u32 15, %v2789_v13  ;;  %v1082_v10 = vshra.s32 %v2780_v9, 3  ;;  %vm4145_vm15 = vmmov %vm4133_vm4 }
 0x75a   :  { %v1016_v3 = vsel %vm4136_vm6, %v968_v18, %v2482_v26  ;;  %v1015_v20 = vsel %vm4137_vm12, %v967_v29, %v2481_v53  ;;  %2258 = vmatpush3.bf16.xpose.msra.mxu1 %v1031_v32  ;;  %2271 = vmatprep.subr.bf16.mxu0 %v4094_v45  ;;  %v1023_v43 = vpack.c.bf16 %v956_v17, %v955_v14  ;;  %v1083_v26 = vshra.s32 %v2845_v40, 3  ;;  %v2525_v40 = vld [vmem:[%s3986_s8 + $0x20] sm:$0xff]  }
 0x75b   :  { %v1106_v47 = vpack.c.bf16 %v1016_v3, %v1015_v20  ;;  %2259 = vmatprep.subr.bf16.mxu1 %v4094_v45  ;;  %v1085_v27 = vshra.s32 %v1084_v19, 3  ;;  %vm1090_vm6 = vcmask 523264   ;;  %v977_v22 = vsel %vm3564_vm5, 1.0, %v4094_v45 }
 0x75c   :  { %v1037_v6 = vsel %vm4143_vm11, %v1023_v43, 0  ;;  %v978_v5 = vsel %vm3569_vm0, 1.0, %v4094_v45  ;;  %vm4146_vm11 = vmmov %vm4133_vm4 }
 0x75d   :  { %2272 = vmatpush3.bf16.msra.mxu0 %v1106_v47  ;;  %vm1086_vm14 = vcmp.eq.s32.totalorder %v1082_v10, %v1085_v27  ;;  %vm1087_vm12 = vcmp.eq.s32.totalorder %v1083_v26, %v1085_v27  ;;  %v2488_v47 = vpack.i.bf16 %v978_v5, %v977_v22  ;;  %v969_v27 = vsel %vm3564_vm5, %v3516_v11, 0.0  ;;  %vm4147_vm5 = vmmov %vm4133_vm4 }
 0x75e   :  { %2273 = vmatprep.subr.bf16.mxu0 %v4094_v45 }
 0x762   :  { %2260 = vmatpush3.bf16.xpose.msra.mxu1 %v1034_v52 }
 0x763   :  { %2261 = vmatprep.subr.bf16.mxu1 %v4094_v45 }
 0x76a   :  { %2262 = vmatpush3.bf16.xpose.msra.mxu1 %v1037_v6 }
 0x76b   :  { %2287 = vmatprep.subr.bf16.mxu1 %v4094_v45 }
 0x771   :  { %2264 = vmatmul.mubr.msk.bf16.vlgmr.msra.gmra.mrb[8].mxu1 %vm4133_vm4, %v1019_v30 }
 0x772   :  { %2291 = vmatprep.mubr.msk.bf16.mxu1 %vm4144_vm13, %v4094_v45 }
 0x844   :  { %v1073_v53 = vpop.f32.mrb[8].mxu1 }
 0x845   :  { %v1080_v29 = vmul.f32 0.35355338, %v1073_v53  ;;  %v2265_v18 = vpop.f32.mrb[9].mxu1  ;;  %v970_v53 = vsel %vm3569_vm0, %v3514_v42, 0.0  ;;  %v2521_v42 = vld [vmem:[%s3986_s8 + $0x10] sm:$0xff]   ;;  %vm4148_vm0 = vmmov %vm4133_vm4 }
 0x846   :  { %v1076_v4 = vpop.f32.mrb[10].mxu1  ;;  %v1189_v11 = vsel %vm4147_vm5, %v2521_v42, 0  ;;  %v1192_v39 = vsel %vm4148_vm0, %v2522_v55, 0  ;;  %vm4149_vm4 = vmmov %vm4148_vm0 }
 0x847   :  { %v1081_v44 = vmul.f32 0.35355338, %v1076_v4  ;;  %v2266_v30 = vpop.f32.mrb[11].mxu1  ;;  %v1088_v32 = vsel %vm1086_vm14, %v1080_v29, -1e+30  ;;  %vm4150_vm14 = vmmov %vm4148_vm0 }
 0x848   :  { %v1091_v13 = vsel %vm1090_vm6, %v1088_v32, -inf  ;;  %vm4155_vm5 = vmmov %vm4148_vm0 }
 0x849   :  { %1092 = vmax.xlane.f32.xlu1 %v1091_v13  ;;  %v1089_v3 = vsel %vm1087_vm12, %v1081_v44, -1e+30  ;;  %vm4152_vm12 = vmmov %vm4148_vm0 }
 0x84a   :  { %v1094_v20 = vsel %vm1090_vm6, %v1089_v3, -inf }
 0x84d   :  { %1095 = vmax.xlane.f32.xlu1 %v1094_v20 }
 0x85e   :  { %2489 = vrot.lane.b32.xlu1 %v2488_v47, %s2618_s22 }
 0x8d6   :  { %v1093_v48 = vpop.xlane.xlu1 %1092 }
 0x8d7   :  { %v1097_v0 = vsub.f32 %v1088_v32, %v1093_v48 }
 0x8d9   :  { %v1099_v56 = vmul.f32 1.442695, %v1097_v0 }
 0x8da   :  { %v1096_v52 = vpop.xlane.xlu1 %1095 }
 0x8db   :  { %v1098_v14 = vsub.f32 %v1089_v3, %v1096_v52  ;;  %2565 = vpow2.f32 %v1099_v56 }
 0x8dd   :  { %v1101_v17 = vmul.f32 1.442695, %v1098_v14 }
 0x8de   :  { %v2490_v43 = vpop.permute.xlu1 %2489 }
 0x8df   :  { %2567 = vpow2.f32 %v1101_v17  ;;  %v2492_v6 = vunpack.i.h.bf16 %v2490_v43  ;;  %v2491_v19 = vunpack.i.l.bf16 %v2490_v43  ;;  %v2073_v17 = vld [vmem:[%s3989_s9 + $0x1] ss:$0 sm:$0xff] }
 0x8e1   :  { %v1018_v29 = vsel %vm4145_vm15, %v970_v53, %v2492_v6  ;;  %v1017_v18 = vsel %vm4146_vm11, %v969_v27, %v2491_v19  ;;  %vm4153_vm15 = vmmov %vm4148_vm0 }
 0x8e2   :  { %v1107_v4 = vpack.c.bf16 %v1018_v29, %v1017_v18  ;;  %vm4154_vm11 = vmmov %vm4148_vm0 }
 0x8e4   :  { %2274 = vmatpush3.bf16.msra.mxu0 %v1107_v4 }
 0x8e5   :  { %2279 = vmatprep.subr.bf16.mxu0 %v4094_v45  ;;  %v2566_v44 = vpop.eup %2565 }
 0x8e9   :  { %v2568_v30 = vpop.eup %2567 }
 0x8ea   :  { %v1103_v32 = vpack.c.bf16 %v2568_v30, %v2566_v44 }
 0x8ec   :  { %2276 = vmatmul.mubr.msk.bf16.vlgmr.msra.gmra.mrb[16].mxu0 %vm1090_vm6, %v1103_v32  ;;  %vm4151_vm6 = vmmov %vm4148_vm0 }
 0x8ed   :  { %2283 = vmatprep.mubr.msk.bf16.mxu0 %vm4144_vm13, %v4094_v45  ;;  %2280 = vmatpush3.bf16.xpose.msra.mxu0 %v1189_v11 }
 0x8ee   :  { %2281 = vmatprep.subr.bf16.mxu0 %v4094_v45 }
 0x8f5   :  { %2282 = vmatpush3.bf16.xpose.msra.mxu0 %v1192_v39 }
 0x8f6   :  { %2295 = vmatprep.subr.bf16.mxu0 %v4094_v45 }
 0x9bf   :  { %v1145_v13 = vpop.f32.mrb[16].mxu0 }
 0x9c0   :  { %2569 = vrcp.f32 %v1145_v13  ;;  %v2277_v3 = vpop.f32.mrb[17].mxu0 }
 0x9c1   :  { %v1148_v20 = vpop.f32.mrb[18].mxu0 }
 0x9c2   :  { %2571 = vrcp.f32 %v1148_v20  ;;  %v2278_v22 = vpop.f32.mrb[19].mxu0 }
 0x9ca   :  { %v2570_v5 = vpop.eup %2569 }
 0x9cb   :  { %1156 = vrot.lane.b32.xlu0 %v2570_v5, %s2617_s3  ;;  %v2524_v5 = vld [vmem:[%s3990_s6 + $0x8] sm:$0xff]  }
 0x9cc   :  { %v2572_v47 = vpop.eup %2571 }
 0x9cd   :  { %1158 = vrot.lane.b32.xlu1 %v2572_v47, %s2617_s3  ;;  %v1290_v47 = vsel %vm4155_vm5, %v2524_v5, 0  ;;  %vm4183_vm5 = vmmov %vm4148_vm0 }
 0xa3d   :  { %v1157_v48 = vpop.permute.xlu0 %1156 }
 0xa3e   :  { %v1162_v56 = vmul.f32 %v1157_v48, %v1145_v13 }
 0xa3f   :  { %v1159_v0 = vpop.permute.xlu1 %1158 }
 0xa40   :  { %v1163_v52 = vmul.f32 %v1159_v0, %v1148_v20 }
 0xa42   :  { %v1164_v14 = vpack.c.bf16 %v1163_v52, %v1162_v56 }
 0xa44   :  { %2284 = vmatmul.mubr.msk.bf16.vlgmr.msra.gmra.mrb[20].mxu0 %vm4149_vm4, %v1164_v14  ;;  %vm4173_vm4 = vmmov %vm4148_vm0 }
 0xa45   :  { %2311 = vmatprep.mubr.msk.bf16.mxu0 %vm4144_vm13, %v4094_v45 }
 0xb17   :  { %v1228_v43 = vpop.f32.mrb[20].mxu0 }
 0xb18   :  { %v1229_v6 = vadd.f32 %v2073_v17, %v1228_v43  ;;  %v2285_v19 = vpop.f32.mrb[21].mxu0 }
 0xb19   :  { %v1231_v27 = vpop.f32.mrb[22].mxu0 }
 0xb1a   :  { %v1232_v53 = vadd.f32 %v2073_v17, %v1231_v27  ;;  %v2286_v29 = vpop.f32.mrb[23].mxu0  ;;  %v1235_v18 = vsel %vm4150_vm14, %v1229_v6, 0.0 }
 0xb1b   :  { %1236 = vadd.xlane.f32.xlu0 %v1235_v18 }
 0xb1c   :  { %v1238_v4 = vsel %vm4151_vm6, %v1232_v53, 0.0 }
 0xb1d   :  { %1239 = vadd.xlane.f32.xlu1 %v1238_v4 }
 0xb2e   :  { %2499 = vrot.lane.b32.xlu1 %v2887_v60, %s2618_s22  ;;  %v2523_v60 = vld [vmem:[%s3990_s6] sm:$0xff]  }
 0xb2f   :  { %v1287_v22 = vsel %vm4154_vm11, %v2523_v60, 0  ;;  %v4162_v60 = vpack.c.bf16 %v3107_v31, %v3112_v16  ;;  %v4167_v31 = vld [vmem:[#allocation4_spill] sm:$0xff]  ;;  %vm4182_vm11 = vnez %v4074_v37 }
 0xb30   :  { %2288 = vmatpush3.bf16.xpose.msra.mxu1 %v1287_v22  ;;  %v4168_v22 = vld [vmem:[#allocation5_spill] sm:$0xff] }
 0xb31   :  { %2289 = vmatprep.subr.bf16.mxu1 %v4094_v45  ;;  %v4169_v5 = vpack.c.bf16 %v4167_v31, %v4168_v22  ;;  %v2054_v22 = vld [vmem:[%s3989_s9] ss:$0 sm:$0xff] }
 0xb38   :  { %2290 = vmatpush3.bf16.xpose.msra.mxu1 %v1290_v47  ;;  %v4171_v47 = vld [vmem:[#allocation7_spill] sm:$0xff] }
 0xb39   :  { %2315 = vmatprep.subr.bf16.mxu1 %v4094_v45 }
 0xba8   :  { %v1237_v44 = vpop.xlane.xlu0 %1236 }
 0xba9   :  { %v1241_v30 = vmul.f32 0.03125, %v1237_v44 }
 0xbaa   :  { %v1240_v32 = vpop.xlane.xlu1 %1239 }
 0xbab   :  { %v1243_v42 = vsub.f32 %v1229_v6, %v1241_v30  ;;  %v1242_v11 = vmul.f32 0.03125, %v1240_v32 }
 0xbad   :  { %v1244_v55 = vsub.f32 %v1232_v53, %v1242_v11  ;;  %v1245_v39 = vmul.f32 %v1243_v42, %v1243_v42 }
 0xbae   :  { %v2500_v17 = vpop.permute.xlu1 %2499 }
 0xbaf   :  { %v1247_v13 = vsel %vm4152_vm12, %v1245_v39, 0.0  ;;  %v1246_v3 = vmul.f32 %v1244_v55, %v1244_v55  ;;  %v3655_v27 = vunpack.i.h.bf16 %v2500_v17  ;;  %v3657_v53 = vunpack.i.l.bf16 %v2500_v17  ;;  %vm4180_vm12 = vmmov %vm4148_vm0 }
 0xbb0   :  { %1248 = vadd.xlane.f32.xlu0 %v1247_v13  ;;  %v4179_v17 = vpack.c.bf16 %v3364_v12, %v3367_v33 }
 0xbb1   :  { %v1250_v20 = vsel %vm4153_vm15, %v1246_v3, 0.0  ;;  %v1347_v30 = vsel %vm2812_vm1, %v3657_v53, 0.0  ;;  %v1348_v32 = vsel %vm2817_vm2, %v3655_v27, 0.0  ;;  %vm4157_vm1 = vmmov %vm4148_vm0  ;;  %vm4181_vm15 = vnez %v4072_v51 }
 0xbb2   :  { %v1395_v11 = vpack.c.bf16 %v1348_v32, %v1347_v30  ;;  %vm4160_vm2 = vmmov %vm4148_vm0  ;;  %v4187_v32 = vld [vmem:[#allocation8_spill] sm:$0xff] }
 0xbb4   :  { %1251 = vadd.xlane.f32.xlu0 %v1250_v20 }
 0xbca   :  { %2494 = vrot.lane.b32.xlu0 %v2837_v36, %s2618_s22 }
 0xc3d   :  { %v1249_v48 = vpop.xlane.xlu0 %1248 }
 0xc3e   :  { %v1253_v36 = vmul.f32 0.03125, %v1249_v48  ;;  %v4172_v48 = vpack.c.bf16 %v4170_v25, %v4171_v47  ;;  %v2609_v25 = vld [vmem:[%s4040_s23 + $0x8] sm:$0xff] }
 0xc40   :  { %v1255_v0 = vadd.f32 1e-05, %v1253_v36 }
 0xc41   :  { %v1252_v56 = vpop.xlane.xlu0 %1251 }
 0xc42   :  { %v1254_v52 = vmul.f32 0.03125, %v1252_v56  ;;  %2573 = vrsqrt.f32 %v1255_v0  ;;  %v4176_v0 = vld [vmem:[#allocation3_spill] sm:$0xff] }
 0xc43   :  { %vm4177_vm6 = vnez %v4176_v0  ;;  %v784_v0 = vadd.f32 %v3436_v28, %v2054_v22 }
 0xc44   :  { %v1256_v14 = vadd.f32 1e-05, %v1254_v52  ;;  %v1356_v56 = vsel %vm4177_vm6, %v3655_v27, 0.0  ;;  %v4178_v52 = vpack.c.bf16 %v3342_v54, %v3345_v1  ;;  %vm4192_vm6 = vmmov %vm4157_vm1 }
 0xc45   :  { %v2495_v43 = vpop.permute.xlu0 %2494 }
 0xc46   :  { %2575 = vrsqrt.f32 %v1256_v14  ;;  %v3651_v6 = vunpack.i.h.bf16 %v2495_v43  ;;  %v3653_v19 = vunpack.i.l.bf16 %v2495_v43 }
 0xc48   :  { %v1345_v29 = vsel %vm2892_vm7, %v3653_v19, 0.0  ;;  %v1346_v18 = vsel %vm2897_vm8, %v3651_v6, 0.0  ;;  %vm4156_vm7 = vmmov %vm4148_vm0  ;;  %v1349_v23 = vsel %vm2915_vm9, %v3653_v19, 0.0  ;;  %v1350_v24 = vsel %vm2923_vm10, %v3651_v6, 0.0 }
 0xc49   :  { %v1394_v4 = vpack.c.bf16 %v1346_v18, %v1345_v29  ;;  %v1409_v3 = vsel %vm4156_vm7, %v1395_v11, 0  ;;  %vm4161_vm8 = vnez %v4048_v38  ;;  %vm4164_vm9 = vmmov %vm4148_vm0  ;;  %vm4166_vm10 = vnez %v4052_v57  ;;  %v4174_v57 = vld [vmem:[#allocation2_spill] sm:$0xff] }
 0xc4a   :  { %v1354_v16 = vsel %vm4166_vm10, %v3651_v6, 0.0  ;;  %vm4175_vm14 = vnez %v4174_v57  ;;  %v1357_v29 = vsel %vm4181_vm15, %v3653_v19, 0.0  ;;  %v1358_v54 = vsel %vm4182_vm11, %v3651_v6, 0.0  ;;  %v2077_v6 = vld [vmem:[%s3991_s7] ss:$0 sm:$0xff]  ;;  %vm4189_vm10 = vmmov %vm4157_vm1  ;;  %v2610_v57 = vld [vmem:[%s4040_s23 + $0x10] sm:$0xff] }
 0xc4b   :  { %v1406_v44 = vsel %vm4148_vm0, %v1394_v4, 0  ;;  %v1355_v36 = vsel %vm4175_vm14, %v3657_v53, 0.0  ;;  %v1400_v1 = vpack.c.bf16 %v1358_v54, %v1357_v29  ;;  %vm4184_vm0 = vnez %v4076_v61  ;;  %vm4191_vm14 = vmmov %vm4157_vm1 }
 0xc4c   :  { %2296 = vmatpush3.bf16.xpose.msra.mxu0 %v1406_v44  ;;  %v2574_v62 = vpop.eup %2573  ;;  %v1399_v14 = vpack.c.bf16 %v1356_v56, %v1355_v36  ;;  %v1359_v12 = vsel %vm4184_vm0, %v3657_v53, 0.0  ;;  %vm4185_vm7 = vnez %v4078_v41  ;;  %vm4194_vm15 = vmmov %vm4157_vm1 }
 0xc4d   :  { %2297 = vmatprep.subr.bf16.mxu0 %v4094_v45  ;;  %v1259_v13 = vmul.f32 %v2574_v62, %v1243_v42  ;;  %v4158_v42 = vpack.c.bf16 %v3078_v8, %v3083_v46  ;;  %v1351_v8 = vsel %vm2833_vm3, %v3657_v53, 0.0  ;;  %v1352_v46 = vsel %vm4161_vm8, %v3655_v27, 0.0  ;;  %vm4195_vm11 = vmmov %vm4157_vm1 }
 0xc4e   :  { %v1397_v58 = vpack.c.bf16 %v1352_v46, %v1351_v8  ;;  %vm4165_vm3 = vnez %v4050_v49  ;;  %v1421_v43 = vsel %vm4180_vm12, %v1399_v14, 0  ;;  %v1424_v18 = vsel %vm4183_vm5, %v1400_v1, 0  ;;  %v2526_v46 = vld [vmem:[%s3986_s8 + $0x28] sm:$0xff]   ;;  %vm4193_vm12 = vmmov %vm4157_vm1 }
 0xc4f   :  { %v1353_v38 = vsel %vm4165_vm3, %v3653_v19, 0.0  ;;  %v1360_v33 = vsel %vm4185_vm7, %v3655_v27, 0.0  ;;  %vm1472_vm8 = vcmp.eq.s32.totalorder %v1082_v10, %v4187_v32  ;;  %vm4188_vm3 = vmmov %vm4157_vm1 }
 0xc50   :  { %v2576_v39 = vpop.eup %2575  ;;  %v1415_v35 = vsel %vm4164_vm9, %v1397_v58, 0  ;;  %v1398_v21 = vpack.c.bf16 %v1354_v16, %v1353_v38  ;;  %v1401_v51 = vpack.c.bf16 %v1360_v33, %v1359_v12  ;;  %vm1473_vm9 = vcmp.eq.s32.totalorder %v1083_v26, %v4187_v32  ;;  %v2528_v33 = vld [vmem:[%s3992_s10 + $0x8] sm:$0xff]   ;;  %vm4196_vm5 = vmmov %vm4157_vm1  ;;  %v2086_v32 = vld [vmem:[%s3989_s9 + $0x2] ss:$0 sm:$0xff] }
 0xc51   :  { %v1260_v63 = vmul.f32 %v2576_v39, %v1244_v55  ;;  %v1396_v55 = vpack.c.bf16 %v1350_v24, %v1349_v23  ;;  %v1573_v26 = vsel %vm4188_vm3, %v2525_v40, 0  ;;  %vm4197_vm0 = vmmov %vm4157_vm1  ;;  %v2614_v40 = vld [vmem:[%s3985_s1 + $0x8] sm:$0xff] }
 0xc52   :  { %v1418_v49 = vsel %vm4173_vm4, %v1398_v21, 0  ;;  %v1427_v37 = vsel %vm4157_vm1, %v1401_v51, 0  ;;  %v781_v21 = vadd.f32 %v3432_v50, %v2054_v22  ;;  %vm4190_vm4 = vmmov %vm4157_vm1  ;;  %v2611_v50 = vld [vmem:[%s4040_s23] sm:$0xff]  ;;  %v1804_v51 = vsel %vm4196_vm5, %v2528_v33, 0 }
 0xc53   :  { %v1261_v20 = vpack.c.bf16 %v1260_v63, %v1259_v13  ;;  %v1412_v15 = vsel %vm4160_vm2, %v1396_v55, 0  ;;  %vm4186_vm2 = vmmov %vm4157_vm1 }
 0xc54   :  { %2298 = vmatpush3.bf16.xpose.msra.mxu0 %v1409_v3  ;;  %v789_v36 = vadd.f32 %v2610_v57, %v781_v21  ;;  %vm4198_vm7 = vmmov %vm4197_vm0  ;;  %v2532_v21 = vld [vmem:[%s3992_s10 + $0x28] sm:$0xff]  }
 0xc55   :  { %2292 = vmatmul.mubr.msk.bf16.vlgmr.msra.gmra.mrb[12].mxu1 %vm4157_vm1, %v1261_v20  ;;  %2299 = vmatprep.subr.bf16.mxu0 %v4094_v45  ;;  %vm4199_vm1 = vmmov %vm4197_vm0 }
 0xc56   :  { %2316 = vmatpush3.bf16.msra.mxu1 %v4158_v42  ;;  %2331 = vmatprep.mubr.msk.bf16.mxu1 %vm4144_vm13, %v4094_v45  ;;  %v1627_v56 = vsel %vm4191_vm14, %v789_v36, 0.0  ;;  %vm4203_vm3 = vmmov %vm4197_vm0 }
 0xc57   :  { %2317 = vmatprep.subr.bf16.mxu1 %v4094_v45  ;;  %vm4206_vm14 = vmmov %vm4197_vm0 }
 0xc58   :  { %vm4211_vm5 = vmmov %vm4197_vm0 }
 0xc5a   :  { %2318 = vmatpush3.bf16.msra.mxu1 %v4159_v7 }
 0xc5b   :  { %2319 = vmatprep.subr.bf16.mxu1 %v4094_v45 }
 0xc5c   :  { %2300 = vmatpush3.bf16.xpose.msra.mxu0 %v1412_v15 }
 0xc5d   :  { %2301 = vmatprep.subr.bf16.mxu0 %v4094_v45 }
 0xc5e   :  { %2320 = vmatpush3.bf16.msra.mxu1 %v4162_v60  ;;  %v1576_v60 = vsel %vm4189_vm10, %v2526_v46, 0  ;;  %vm4204_vm10 = vmmov %vm4197_vm0 }
 0xc5f   :  { %2321 = vmatprep.subr.bf16.mxu1 %v4094_v45 }
 0xc62   :  { %2322 = vmatpush3.bf16.msra.mxu1 %v4163_v59 }
 0xc63   :  { %2323 = vmatprep.subr.bf16.mxu1 %v4094_v45 }
 0xc64   :  { %2302 = vmatpush3.bf16.xpose.msra.mxu0 %v1415_v35 }
 0xc65   :  { %2303 = vmatprep.subr.bf16.mxu0 %v4094_v45 }
 0xc66   :  { %2324 = vmatpush3.bf16.msra.mxu1 %v4169_v5  ;;  %v776_v5 = vadd.f32 %v2054_v22, %v3438_v34 }
 0xc67   :  { %2325 = vmatprep.subr.bf16.mxu1 %v4094_v45 }
 0xc68   :  { %v788_v47 = vadd.f32 %v2609_v25, %v776_v5  ;;  %v1816_v25 = vsel %vm4206_vm14, %v2532_v21, 0 }
 0xc6a   :  { %2326 = vmatpush3.bf16.msra.mxu1 %v4172_v48  ;;  %v773_v48 = vadd.f32 %v2054_v22, %v3434_v2 }
 0xc6b   :  { %2327 = vmatprep.subr.bf16.mxu1 %v4094_v45 }
 0xc6c   :  { %2304 = vmatpush3.bf16.xpose.msra.mxu0 %v1418_v49  ;;  %v1624_v49 = vsel %vm4190_vm4, %v788_v47, 0.0  ;;  %v787_v34 = vadd.f32 %v2611_v50, %v773_v48  ;;  %vm4205_vm4 = vmmov %vm4197_vm0 }
 0xc6d   :  { %2305 = vmatprep.subr.bf16.mxu0 %v4094_v45 }
 0xc6e   :  { %2328 = vmatpush3.bf16.msra.mxu1 %v4178_v52  ;;  %v1621_v2 = vsel %vm4192_vm6, %v787_v34, 0.0  ;;  %v2612_v52 = vld [vmem:[%s4040_s23 + $0x18] sm:$0xff]  ;;  %vm4207_vm6 = vmmov %vm4197_vm0 }
 0xc6f   :  { %2329 = vmatprep.subr.bf16.mxu1 %v4094_v45  ;;  %v790_v14 = vadd.f32 %v2612_v52, %v784_v0 }
 0xc72   :  { %2330 = vmatpush3.bf16.msra.mxu1 %v4179_v17  ;;  %v1630_v17 = vsel %vm4193_vm12, %v790_v14, 0.0  ;;  %vm4208_vm12 = vmmov %vm4197_vm0 }
 0xc73   :  { %2335 = vmatprep.subr.bf16.mxu1 %v4094_v45 }
 0xc74   :  { %2306 = vmatpush3.bf16.xpose.msra.mxu0 %v1421_v43 }
 0xc75   :  { %2307 = vmatprep.subr.bf16.mxu0 %v4094_v45 }
 0xc7c   :  { %2308 = vmatpush3.bf16.xpose.msra.mxu0 %v1424_v18  ;;  %v2527_v18 = vld [vmem:[%s3992_s10] sm:$0xff]  }
 0xc7d   :  { %2309 = vmatprep.subr.bf16.mxu0 %v4094_v45  ;;  %v1801_v12 = vsel %vm4195_vm11, %v2527_v18, 0  ;;  %vm4210_vm11 = vmmov %vm4197_vm0 }
 0xc84   :  { %2310 = vmatpush3.bf16.xpose.msra.mxu0 %v1427_v37  ;;  %v2529_v37 = vld [vmem:[%s3992_s10 + $0x10] sm:$0xff]  }
 0xc85   :  { %2371 = vmatprep.subr.bf16.mxu0 %v4094_v45 }
 0xd28   :  { %v1326_v19 = vpop.f32.mrb[12].mxu1 }
 0xd29   :  { %v2293_v4 = vpop.f32.mrb[13].mxu1  ;;  %v1327_v53 = vadd.f32 %v2077_v6, %v1326_v19  ;;  %v2530_v19 = vld [vmem:[%s3992_s10 + $0x18] sm:$0xff]  }
 0xd2a   :  { %v1329_v61 = vpop.f32.mrb[14].mxu1  ;;  %v1810_v4 = vsel %vm4198_vm7, %v2530_v19, 0  ;;  %vm4212_vm7 = vmmov %vm4197_vm0 }
 0xd2b   :  { %v1330_v44 = vadd.f32 %v2077_v6, %v1329_v61  ;;  %v2294_v30 = vpop.f32.mrb[15].mxu1  ;;  %v1807_v6 = vsel %vm4197_vm0, %v2529_v37, 0  ;;  %v2531_v61 = vld [vmem:[%s3992_s10 + $0x20] sm:$0xff]  }
 0xd2d   :  { %v1393_v41 = vpack.c.bf16 %v1330_v44, %v1327_v53  ;;  %v1813_v53 = vsel %vm4199_vm1, %v2531_v61, 0  ;;  %vm4214_vm1 = vmmov %vm4197_vm0 }
 0xd2f   :  { %2312 = vmatmul.mubr.msk.bf16.vlgmr.msra.gmra.mrb[24].mxu0 %vm4186_vm2, %v1393_v41  ;;  %vm4200_vm2 = vmmov %vm4197_vm0 }
 0xd30   :  { %2375 = vmatprep.mubr.msk.bf16.mxu0 %vm4144_vm13, %v4094_v45 }
 0xe02   :  { %v1463_v27 = vpop.f32.mrb[24].mxu0 }
 0xe03   :  { %v1470_v62 = vmul.f32 0.35355338, %v1463_v27  ;;  %v2313_v11 = vpop.f32.mrb[25].mxu0 }
 0xe04   :  { %v1466_v39 = vpop.f32.mrb[26].mxu0 }
 0xe05   :  { %v1471_v13 = vmul.f32 0.35355338, %v1466_v39  ;;  %v2314_v63 = vpop.f32.mrb[27].mxu0  ;;  %v1474_v3 = vsel %vm1472_vm8, %v1470_v62, -1e+30  ;;  %vm4201_vm8 = vmmov %vm4197_vm0 }
 0xe06   :  { %1476 = vmax.xlane.f32.xlu1 %v1474_v3 }
 0xe07   :  { %v1475_v20 = vsel %vm1473_vm9, %v1471_v13, -1e+30  ;;  %vm4202_vm9 = vmmov %vm4197_vm0 }
 0xe08   :  { %1478 = vmax.xlane.f32.xlu0 %v1475_v20 }
 0xe93   :  { %v1477_v23 = vpop.xlane.xlu1 %1476 }
 0xe94   :  { %v1480_v24 = vsub.f32 %v1474_v3, %v1477_v23 }
 0xe95   :  { %v1479_v42 = vpop.xlane.xlu0 %1478 }
 0xe96   :  { %v1482_v55 = vmul.f32 1.442695, %v1480_v24  ;;  %v1481_v7 = vsub.f32 %v1475_v20, %v1479_v42 }
 0xe98   :  { %v1484_v9 = vmul.f32 1.442695, %v1481_v7  ;;  %2577 = vpow2.f32 %v1482_v55 }
 0xe9a   :  { %2579 = vpow2.f32 %v1484_v9  ;;  %v2613_v9 = vld [vmem:[%s3985_s1] sm:$0xff] }
 0xea2   :  { %v2578_v10 = vpop.eup %2577 }
 0xea4   :  { %v2580_v15 = vpop.eup %2579 }
 0xea5   :  { %v1486_v8 = vpack.c.bf16 %v2580_v15, %v2578_v10 }
 0xea7   :  { %2332 = vmatmul.mubr.bf16.vlgmr.msra.gmra.mrb[16].mxu1 %v1486_v8 }
 0xea8   :  { %2339 = vmatprep.mubr.msk.bf16.mxu1 %vm4144_vm13, %v4094_v45  ;;  %2336 = vmatpush3.bf16.xpose.msra.mxu1 %v1573_v26 }
 0xea9   :  { %2337 = vmatprep.subr.bf16.mxu1 %v4094_v45 }
 0xeb0   :  { %2338 = vmatpush3.bf16.xpose.msra.mxu1 %v1576_v60 }
 0xeb1   :  { %2343 = vmatprep.subr.bf16.mxu1 %v4094_v45 }
 0xf7a   :  { %v1529_v58 = vpop.f32.mrb[16].mxu1 }
 0xf7b   :  { %2581 = vrcp.f32 %v1529_v58  ;;  %v2333_v59 = vpop.f32.mrb[17].mxu1 }
 0xf7c   :  { %v1532_v35 = vpop.f32.mrb[18].mxu1 }
 0xf7d   :  { %2583 = vrcp.f32 %v1532_v35  ;;  %v2334_v38 = vpop.f32.mrb[19].mxu1 }
 0xf85   :  { %v2582_v16 = vpop.eup %2581 }
 0xf86   :  { %1540 = vrot.lane.b32.xlu0 %v2582_v16, %s2617_s3 }
 0xf87   :  { %v2584_v31 = vpop.eup %2583 }
 0xf88   :  { %1542 = vrot.lane.b32.xlu1 %v2584_v31, %s2617_s3 }
 0xfa5   :  { %1625 = vadd.xlane.f32.xlu0 %v1624_v49  ;;  %v2534_v49 = vld [vmem:[%s3992_s10 + $0x38] sm:$0xff]  }
 0xfa6   :  { %v1822_v57 = vsel %vm4208_vm12, %v2534_v49, 0 }
 0xfa9   :  { %1628 = vadd.xlane.f32.xlu0 %v1627_v56 }
 0xfac   :  { %1622 = vadd.xlane.f32.xlu1 %v1621_v2 }
 0xfb0   :  { %1631 = vadd.xlane.f32.xlu1 %v1630_v17 }
 0xff8   :  { %v1541_v28 = vpop.permute.xlu0 %1540 }
 0xff9   :  { %v1546_v29 = vmul.f32 %v1541_v28, %v1529_v58 }
 0xffa   :  { %v1543_v43 = vpop.permute.xlu1 %1542 }
 0xffb   :  { %v1547_v54 = vmul.f32 %v1543_v43, %v1532_v35 }
 0xffd   :  { %v1548_v1 = vpack.c.bf16 %v1547_v54, %v1546_v29 }
 0xfff   :  { %2340 = vmatmul.mubr.msk.bf16.vlgmr.msra.gmra.mrb[20].mxu1 %vm4194_vm15, %v1548_v1  ;;  %vm4209_vm15 = vmmov %vm4197_vm0 }
0x1000   :  { %2359 = vmatprep.mubr.msk.bf16.mxu1 %vm4144_vm13, %v4094_v45  ;;  %2344 = vmatpush3.bf16.xpose.msra.mxu1 %v1801_v12 }
0x1001   :  { %2345 = vmatprep.subr.bf16.mxu1 %v4094_v45 }
0x1008   :  { %2346 = vmatpush3.bf16.xpose.msra.mxu1 %v1804_v51 }
0x1009   :  { %2347 = vmatprep.subr.bf16.mxu1 %v4094_v45 }
0x1010   :  { %2348 = vmatpush3.bf16.xpose.msra.mxu1 %v1807_v6 }
0x1011   :  { %2349 = vmatprep.subr.bf16.mxu1 %v4094_v45 }
0x1018   :  { %2350 = vmatpush3.bf16.xpose.msra.mxu1 %v1810_v4 }
0x1019   :  { %2351 = vmatprep.subr.bf16.mxu1 %v4094_v45 }
0x1020   :  { %2352 = vmatpush3.bf16.xpose.msra.mxu1 %v1813_v53  ;;  %v2090_v53 = vld [vmem:[%s3993_s14] ss:$0 sm:$0xff] }
0x1021   :  { %2353 = vmatprep.subr.bf16.mxu1 %v4094_v45 }
0x1028   :  { %2354 = vmatpush3.bf16.xpose.msra.mxu1 %v1816_v25 }
0x1029   :  { %2355 = vmatprep.subr.bf16.mxu1 %v4094_v45 }
0x1032   :  { %v1626_v44 = vpop.xlane.xlu0 %1625 }
0x1033   :  { %v1640_v62 = vmul.f32 0.03125, %v1626_v44 }
0x1035   :  { %v3840_v24 = vsub.f32 %v788_v47, %v1640_v62  ;;  %v2533_v47 = vld [vmem:[%s3992_s10 + $0x30] sm:$0xff]   ;;  %v2091_v62 = vld [vmem:[%s3994_s15] ss:$0 sm:$0xff] }
0x1036   :  { %v1629_v27 = vpop.xlane.xlu0 %1628  ;;  %v1819_v48 = vsel %vm4207_vm6, %v2533_v47, 0  ;;  %v3937_v47 = vld [vmem:[%s3996_s11] ss:$0 sm:$0xff] }
0x1037   :  { %v1641_v13 = vmul.f32 0.03125, %v1629_v27  ;;  %v1652_v59 = vmul.f32 %v3840_v24, %v3840_v24  ;;  %2356 = vmatpush3.bf16.xpose.msra.mxu1 %v1819_v48 }
0x1038   :  { %2357 = vmatprep.subr.bf16.mxu1 %v4094_v45 }
0x1039   :  { %v1623_v30 = vpop.xlane.xlu1 %1622  ;;  %v3845_v15 = vsub.f32 %v789_v36, %v1641_v13  ;;  %v1660_v16 = vsel %vm4203_vm3, %v1652_v59, 0.0  ;;  %vm4218_vm3 = vmmov %vm4197_vm0 }
0x103a   :  { %v1639_v41 = vmul.f32 0.03125, %v1623_v30 }
0x103b   :  { %v1653_v38 = vmul.f32 %v3845_v15, %v3845_v15 }
0x103c   :  { %v3838_v63 = vsub.f32 %v787_v34, %v1639_v41 }
0x103d   :  { %v1632_v11 = vpop.xlane.xlu1 %1631  ;;  %v1663_v22 = vsel %vm4204_vm10, %v1653_v38, 0.0 }
0x103e   :  { %v1642_v42 = vmul.f32 0.03125, %v1632_v11  ;;  %v1651_v46 = vmul.f32 %v3838_v63, %v3838_v63 }
0x103f   :  { %2358 = vmatpush3.bf16.xpose.msra.mxu1 %v1822_v57 }
0x1040   :  { %v3853_v60 = vsub.f32 %v790_v14, %v1642_v42  ;;  %v1657_v35 = vsel %vm4202_vm9, %v1651_v46, 0.0  ;;  %vm4217_vm9 = vmmov %vm4197_vm0 }
0x1042   :  { %v1654_v31 = vmul.f32 %v3853_v60, %v3853_v60 }
0x1044   :  { %v1666_v5 = vsel %vm4205_vm4, %v1654_v31, 0.0 }
0x10d2   :  { %v1612_v39 = vpop.f32.mrb[20].mxu1 }
0x10d3   :  { %v1613_v3 = vadd.f32 %v2086_v32, %v1612_v39  ;;  %v2341_v20 = vpop.f32.mrb[21].mxu1 }
0x10d4   :  { %v1615_v23 = vpop.f32.mrb[22].mxu1 }
0x10d5   :  { %v1616_v55 = vadd.f32 %v2086_v32, %v1615_v23  ;;  %v2342_v7 = vpop.f32.mrb[23].mxu1  ;;  %v1619_v10 = vadd.f32 %v2613_v9, %v1613_v3 }
0x10d7   :  { %v1633_v8 = vsel %vm4200_vm2, %v1619_v10, 0.0  ;;  %v1620_v26 = vadd.f32 %v2614_v40, %v1616_v55  ;;  %vm4215_vm2 = vmmov %vm4197_vm0 }
0x10d8   :  { %1634 = vadd.xlane.f32.xlu0 %v1633_v8 }
0x10d9   :  { %v1636_v58 = vsel %vm4201_vm8, %v1620_v26, 0.0  ;;  %vm4216_vm8 = vmmov %vm4197_vm0 }
0x10da   :  { %1637 = vadd.xlane.f32.xlu1 %v1636_v58 }
0x10dc   :  { %1658 = vadd.xlane.f32.xlu0 %v1657_v35 }
0x10de   :  { %1661 = vadd.xlane.f32.xlu1 %v1660_v16 }
0x10e0   :  { %1664 = vadd.xlane.f32.xlu0 %v1663_v22 }
0x10e2   :  { %1667 = vadd.xlane.f32.xlu1 %v1666_v5 }
0x1165   :  { %v1635_v36 = vpop.xlane.xlu0 %1634 }
0x1166   :  { %v1643_v0 = vmul.f32 0.03125, %v1635_v36 }
0x1167   :  { %v1638_v50 = vpop.xlane.xlu1 %1637 }
0x1168   :  { %v3880_v34 = vsub.f32 %v1619_v10, %v1643_v0  ;;  %v1644_v56 = vmul.f32 0.03125, %v1638_v50  ;;  %v2535_v10 = vld [vmem:[%s3995_s12] sm:$0xff]  }
0x1169   :  { %v1659_v2 = vpop.xlane.xlu0 %1658  ;;  %2372 = vmatpush3.bf16.xpose.msra.mxu0 %v2535_v10 }
0x116a   :  { %v3882_v52 = vsub.f32 %v1620_v26, %v1644_v56  ;;  %v1675_v14 = vmul.f32 0.03125, %v1659_v2  ;;  %v1655_v17 = vmul.f32 %v3880_v34, %v3880_v34  ;;  %2373 = vmatprep.subr.bf16.mxu0 %v4094_v45 }
0x116b   :  { %v1662_v28 = vpop.xlane.xlu1 %1661 }
0x116c   :  { %v1681_v43 = vadd.f32 1e-05, %v1675_v14  ;;  %v1676_v29 = vmul.f32 0.03125, %v1662_v28  ;;  %v1669_v54 = vsel %vm4209_vm15, %v1655_v17, 0.0  ;;  %v1656_v1 = vmul.f32 %v3882_v52, %v3882_v52 }
0x116d   :  { %1670 = vadd.xlane.f32.xlu0 %v1669_v54  ;;  %v1665_v18 = vpop.xlane.xlu0 %1664 }
0x116e   :  { %2585 = vrsqrt.f32 %v1681_v43  ;;  %v1682_v12 = vadd.f32 1e-05, %v1676_v29  ;;  %v1677_v33 = vmul.f32 0.03125, %v1665_v18  ;;  %v1672_v51 = vsel %vm4210_vm11, %v1656_v1, 0.0 }
0x116f   :  { %1673 = vadd.xlane.f32.xlu1 %v1672_v51  ;;  %v1668_v37 = vpop.xlane.xlu1 %1667 }
0x1170   :  { %2587 = vrsqrt.f32 %v1682_v12  ;;  %v1683_v6 = vadd.f32 1e-05, %v1677_v33  ;;  %v1678_v19 = vmul.f32 0.03125, %v1668_v37 }
0x1172   :  { %2589 = vrsqrt.f32 %v1683_v6  ;;  %v1684_v4 = vadd.f32 1e-05, %v1678_v19 }
0x1174   :  { %2591 = vrsqrt.f32 %v1684_v4 }
0x1178   :  { %v2586_v61 = vpop.eup %2585 }
0x1179   :  { %v1693_v44 = vmul.f32 %v2586_v61, %v3838_v63 }
0x117a   :  { %v2588_v30 = vpop.eup %2587 }
0x117b   :  { %v1706_v41 = vmul.f32 %v2090_v53, %v1693_v44  ;;  %v1694_v27 = vmul.f32 %v2588_v30, %v3840_v24 }
0x117c   :  { %v2590_v32 = vpop.eup %2589 }
0x117d   :  { %v1707_v11 = vmul.f32 %v2090_v53, %v1694_v27  ;;  %v1695_v13 = vmul.f32 %v2590_v32, %v3845_v15  ;;  %v3900_v20 = vadd.f32 %v2091_v62, %v1706_v41  ;;  %v2536_v15 = vld [vmem:[%s3995_s12 + $0x8] sm:$0xff]  }
0x117e   :  { %v2592_v39 = vpop.eup %2591  ;;  %2374 = vmatpush3.bf16.xpose.msra.mxu0 %v2536_v15 }
0x117f   :  { %v1696_v3 = vmul.f32 %v2592_v39, %v3853_v60  ;;  %v3902_v23 = vadd.f32 %v2091_v62, %v1707_v11  ;;  %v1708_v24 = vmul.f32 %v2090_v53, %v1695_v13 }
0x1181   :  { %v1725_v63 = vpack.c.bf16 %v3902_v23, %v3900_v20  ;;  %v1709_v42 = vmul.f32 %v2090_v53, %v1696_v3  ;;  %v3911_v7 = vadd.f32 %v2091_v62, %v1708_v24 }
0x1183   :  { %2360 = vmatmul.mubr.msk.bf16.vlgmr.msra.gmra.mrb[24].mxu1 %vm4211_vm5, %v1725_v63  ;;  %v3909_v55 = vadd.f32 %v2091_v62, %v1709_v42 }
0x1184   :  { %2363 = vmatprep.mubr.msk.bf16.mxu1 %vm4144_vm13, %v4094_v45 }
0x1185   :  { %v1726_v9 = vpack.c.bf16 %v3909_v55, %v3911_v7 }
0x118b   :  { %2364 = vmatmul.mubr.msk.bf16.gmra.mrb[28].mxu1 %vm4197_vm0, %v1726_v9 }
0x118c   :  { %2367 = vmatprep.mubr.msk.bf16.mxu1 %vm4144_vm13, %v4094_v45 }
0x11fa   :  { %v1671_v8 = vpop.xlane.xlu0 %1670 }
0x11fb   :  { %v1679_v40 = vmul.f32 0.03125, %v1671_v8 }
0x11fc   :  { %v1674_v26 = vpop.xlane.xlu1 %1673 }
0x11fd   :  { %v1685_v46 = vadd.f32 1e-05, %v1679_v40  ;;  %v1680_v60 = vmul.f32 0.03125, %v1674_v26 }
0x11ff   :  { %2593 = vrsqrt.f32 %v1685_v46  ;;  %v1686_v58 = vadd.f32 1e-05, %v1680_v60 }
0x1201   :  { %2595 = vrsqrt.f32 %v1686_v58 }
0x1209   :  { %v2594_v59 = vpop.eup %2593 }
0x120a   :  { %v1697_v35 = vmul.f32 %v2594_v59, %v3880_v34 }
0x120b   :  { %v2596_v38 = vpop.eup %2595 }
0x120c   :  { %v1698_v16 = vmul.f32 %v2596_v38, %v3882_v52  ;;  %v1710_v31 = vmul.f32 %v2090_v53, %v1697_v35 }
0x120e   :  { %v1711_v22 = vmul.f32 %v2090_v53, %v1698_v16  ;;  %v3927_v5 = vadd.f32 %v2091_v62, %v1710_v31 }
0x1210   :  { %v3929_v21 = vadd.f32 %v2091_v62, %v1711_v22 }
0x1212   :  { %v1727_v25 = vpack.c.bf16 %v3929_v21, %v3927_v5 }
0x1214   :  { %2368 = vmatmul.mubr.msk.bf16.gmra.mrb[32].mxu1 %vm4212_vm7, %v1727_v25 }
0x1256   :  { %v1858_v48 = vpop.f32.mrb[24].mxu1 }
0x1257   :  { %v1859_v49 = vadd.f32 %v3937_v47, %v1858_v48  ;;  %v2361_v57 = vpop.f32.mrb[25].mxu1 }
0x1258   :  { %v1861_v36 = vpop.f32.mrb[26].mxu1 }
0x1259   :  { %v1887_v0 = vmul.f32 0.044715, %v1859_v49  ;;  %v1862_v50 = vadd.f32 %v3937_v47, %v1861_v36  ;;  %v2362_v34 = vpop.f32.mrb[27].mxu1  ;;  %v1881_v13 = vmul.f32 0.5, %v1859_v49 }
0x125b   :  { %v1893_v56 = vmul.f32 %v1887_v0, %v1859_v49  ;;  %v1888_v2 = vmul.f32 0.044715, %v1862_v50  ;;  %v1882_v3 = vmul.f32 0.5, %v1862_v50 }
0x125d   :  { %v1899_v52 = vmul.f32 %v1893_v56, %v1859_v49  ;;  %v1894_v14 = vmul.f32 %v1888_v2, %v1862_v50 }
0x125e   :  { %v1866_v17 = vpop.f32.mrb[28].mxu1 }
0x125f   :  { %v1905_v28 = vadd.f32 %v1899_v52, %v1859_v49  ;;  %v1900_v43 = vmul.f32 %v1894_v14, %v1862_v50  ;;  %v1867_v29 = vadd.f32 %v3937_v47, %v1866_v17  ;;  %v2365_v54 = vpop.f32.mrb[29].mxu1 }
0x1260   :  { %v1869_v1 = vpop.f32.mrb[30].mxu1 }
0x1261   :  { %v1911_v18 = vmul.f32 0.7978846, %v1905_v28  ;;  %v1906_v12 = vadd.f32 %v1900_v43, %v1862_v50  ;;  %v1889_v33 = vmul.f32 0.044715, %v1867_v29  ;;  %v1870_v51 = vadd.f32 %v3937_v47, %v1869_v1  ;;  %v2366_v37 = vpop.f32.mrb[31].mxu1 }
0x1262   :  { %v1883_v40 = vmul.f32 0.5, %v1867_v29 }
0x1263   :  { %2597 = vtanh.f32 %v1911_v18  ;;  %v1912_v6 = vmul.f32 0.7978846, %v1906_v12  ;;  %v1895_v19 = vmul.f32 %v1889_v33, %v1867_v29  ;;  %v1890_v4 = vmul.f32 0.044715, %v1870_v51  ;;  %v2106_v12 = vld [vmem:[%s3997_s13] ss:$0 sm:$0xff] }
0x1264   :  { %v1884_v26 = vmul.f32 0.5, %v1870_v51 }
0x1265   :  { %2599 = vtanh.f32 %v1912_v6  ;;  %v1901_v61 = vmul.f32 %v1895_v19, %v1867_v29  ;;  %v1896_v53 = vmul.f32 %v1890_v4, %v1870_v51 }
0x1267   :  { %v1902_v44 = vmul.f32 %v1896_v53, %v1870_v51  ;;  %v1907_v30 = vadd.f32 %v1901_v61, %v1867_v29 }
0x1269   :  { %v1908_v41 = vadd.f32 %v1902_v44, %v1870_v51  ;;  %v1913_v27 = vmul.f32 0.7978846, %v1907_v30 }
0x126b   :  { %v1914_v32 = vmul.f32 0.7978846, %v1908_v41  ;;  %2601 = vtanh.f32 %v1913_v27 }
0x126d   :  { %v2598_v62 = vpop.eup %2597  ;;  %2603 = vtanh.f32 %v1914_v32 }
0x126e   :  { %v1923_v11 = vadd.f32 1.0, %v2598_v62 }
0x126f   :  { %v2600_v39 = vpop.eup %2599 }
0x1270   :  { %v1924_v63 = vadd.f32 1.0, %v2600_v39  ;;  %v1929_v42 = vmul.f32 %v1923_v11, %v1881_v13 }
0x1272   :  { %v1930_v24 = vmul.f32 %v1924_v63, %v1882_v3 }
0x1274   :  { %v1935_v9 = vpack.c.bf16 %v1930_v24, %v1929_v42 }
0x1275   :  { %v2602_v10 = vpop.eup %2601 }
0x1276   :  { %2376 = vmatmul.mubr.bf16.vlgmr.msra.gmra.mrb[28].mxu0 %v1935_v9  ;;  %v1925_v15 = vadd.f32 1.0, %v2602_v10 }
0x1277   :  { %v2604_v8 = vpop.eup %2603  ;;  %2379 = vmatprep.mubr.msk.bf16.mxu0 %vm4144_vm13, %v4094_v45 }
0x1278   :  { %v1926_v46 = vadd.f32 1.0, %v2604_v8  ;;  %v1931_v60 = vmul.f32 %v1925_v15, %v1883_v40 }
0x127a   :  { %v1932_v58 = vmul.f32 %v1926_v46, %v1884_v26 }
0x127c   :  { %v1936_v59 = vpack.c.bf16 %v1932_v58, %v1931_v60 }
0x127e   :  { %2380 = vmatmul.mubr.bf16.gmra.mrb[32].mxu0 %v1936_v59 }
0x127f   :  { %2383 = vmatprep.mubr.msk.bf16.mxu0 %vm4144_vm13, %v4094_v45  ;;  %vm4213_vm13 = vmmov %vm4197_vm0 }
0x12e7   :  { %v1874_v35 = vpop.f32.mrb[32].mxu1 }
0x12e8   :  { %v1875_v38 = vadd.f32 %v3937_v47, %v1874_v35  ;;  %v2369_v16 = vpop.f32.mrb[33].mxu1 }
0x12e9   :  { %v1877_v31 = vpop.f32.mrb[34].mxu1 }
0x12ea   :  { %v1891_v22 = vmul.f32 0.044715, %v1875_v38  ;;  %v1878_v25 = vadd.f32 %v3937_v47, %v1877_v31  ;;  %v2370_v48 = vpop.f32.mrb[35].mxu1  ;;  %v1885_v28 = vmul.f32 0.5, %v1875_v38 }
0x12ec   :  { %v1897_v49 = vmul.f32 %v1891_v22, %v1875_v38  ;;  %v1892_v57 = vmul.f32 0.044715, %v1878_v25  ;;  %v1886_v43 = vmul.f32 0.5, %v1878_v25 }
0x12ee   :  { %v1903_v36 = vmul.f32 %v1897_v49, %v1875_v38  ;;  %v1898_v0 = vmul.f32 %v1892_v57, %v1878_v25 }
0x12f0   :  { %v1904_v50 = vmul.f32 %v1898_v0, %v1878_v25  ;;  %v1909_v34 = vadd.f32 %v1903_v36, %v1875_v38 }
0x12f2   :  { %v1910_v56 = vadd.f32 %v1904_v50, %v1878_v25  ;;  %v1915_v2 = vmul.f32 0.7978846, %v1909_v34 }
0x12f4   :  { %v1916_v52 = vmul.f32 0.7978846, %v1910_v56  ;;  %2605 = vtanh.f32 %v1915_v2 }
0x12f6   :  { %2607 = vtanh.f32 %v1916_v52 }
0x12fe   :  { %v2606_v45 = vpop.eup %2605 }
0x12ff   :  { %v1927_v14 = vadd.f32 1.0, %v2606_v45 }
0x1300   :  { %v2608_v17 = vpop.eup %2607 }
0x1301   :  { %v1928_v29 = vadd.f32 1.0, %v2608_v17  ;;  %v1933_v54 = vmul.f32 %v1927_v14, %v1885_v28 }
0x1303   :  { %v1934_v47 = vmul.f32 %v1928_v29, %v1886_v43 }
0x1305   :  { %v1937_v1 = vpack.c.bf16 %v1934_v47, %v1933_v54 }
0x1307   :  { %2384 = vmatmul.mubr.bf16.gmra.mrb[36].mxu0 %v1937_v1 }
0x1349   :  { %v1988_v18 = vpop.f32.mrb[28].mxu0 }
0x134a   :  { %v2011_v33 = vadd.f32 %v1988_v18, %v3900_v20  ;;  %v2377_v51 = vpop.f32.mrb[29].mxu0 }
0x134b   :  { %v1991_v37 = vpop.f32.mrb[30].mxu0 }
0x134c   :  { %v2024_v6 = vadd.f32 %v2106_v12, %v2011_v33  ;;  %v2012_v19 = vadd.f32 %v1991_v37, %v3902_v23  ;;  %v2378_v4 = vpop.f32.mrb[31].mxu0 }
0x134e   :  { %2030 = vst.msk [vmem:[%s3998_s16] sm:$0xff] %vm4213_vm13, %v2024_v6  ;;  %v2025_v61 = vadd.f32 %v2106_v12, %v2012_v19 }
0x1350   :  { %2031 = vst.msk [vmem:[%s3998_s16 + $0x8] sm:$0xff] %vm4214_vm1, %v2025_v61 }
0x1351   :  { %v1996_v53 = vpop.f32.mrb[32].mxu0 }
0x1352   :  { %v2013_v20 = vadd.f32 %v1996_v53, %v3911_v7  ;;  %v2381_v44 = vpop.f32.mrb[33].mxu0 }
0x1353   :  { %v1999_v30 = vpop.f32.mrb[34].mxu0 }
0x1354   :  { %v2026_v41 = vadd.f32 %v2106_v12, %v2013_v20  ;;  %v2014_v23 = vadd.f32 %v1999_v30, %v3909_v55  ;;  %v2382_v27 = vpop.f32.mrb[35].mxu0 }
0x1356   :  { %2032 = vst.msk [vmem:[%s3998_s16 + $0x10] sm:$0xff] %vm4215_vm2, %v2026_v41  ;;  %v2027_v32 = vadd.f32 %v2106_v12, %v2014_v23 }
0x1358   :  { %2033 = vst.msk [vmem:[%s3998_s16 + $0x18] sm:$0xff] %vm4216_vm8, %v2027_v32 }
0x13da   :  { %v2004_v62 = vpop.f32.mrb[36].mxu0 }
0x13db   :  { %v2015_v7 = vadd.f32 %v2004_v62, %v3927_v5  ;;  %v2385_v11 = vpop.f32.mrb[37].mxu0 }
0x13dc   :  { %v2007_v39 = vpop.f32.mrb[38].mxu0 }
0x13dd   :  { %v2028_v13 = vadd.f32 %v2106_v12, %v2015_v7  ;;  %v2016_v55 = vadd.f32 %v2007_v39, %v3929_v21  ;;  %v2386_v3 = vpop.f32.mrb[39].mxu0 }
0x13df   :  { %2034 = vst.msk [vmem:[%s3998_s16 + $0x20] sm:$0xff] %vm4217_vm9, %v2028_v13  ;;  %v2029_v63 = vadd.f32 %v2106_v12, %v2016_v55 }
0x13e1   :  { %2035 = vst.msk [vmem:[%s3998_s16 + $0x28] sm:$0xff] %vm4218_vm3, %v2029_v63 }

</bundles_post_ra>
